<compile_context>
chip_gen: v7x
topology: tpu7x:2x2x1
jax: 0.10.0
libtpu: 0.0.40
codegen_flags: <defaults>
</compile_context>

<pallas_src>
import functools

import jax
import jax.numpy as jnp
from jax.experimental import pallas as pl
from jax.experimental.pallas import tpu as pltpu


# ----------------------------------------------------------------------------
# In-kernel helpers
# ----------------------------------------------------------------------------

def _ln(x, g, b, eps):
    """LayerNorm over the lane (hidden) axis, f32 math."""
    mu = jnp.mean(x, axis=-1, keepdims=True)
    xc = x - mu
    var = jnp.mean(xc * xc, axis=-1, keepdims=True)
    return xc * jax.lax.rsqrt(var + eps) * g + b


# ----------------------------------------------------------------------------
# Kernels
# ----------------------------------------------------------------------------

def _layernorm_kernel(x_ref, g_ref, b_ref, o_ref, *, eps):
    """Embedding LayerNorm: bf16 in, bf16 out, f32 math."""
    x = x_ref[...].astype(jnp.float32)
    o_ref[...] = _ln(x, g_ref[...], b_ref[...], eps).astype(o_ref.dtype)


def _encoder_layer_kernel(bias_ref, hid_ref,
                          qkv_w_ref, qkv_b_ref, o_w_ref, o_b_ref,
                          aln_g_ref, aln_b_ref,
                          w1_ref, b1_ref, w2_ref, b2_ref,
                          fln_g_ref, fln_b_ref,
                          out_ref, h_scr, ctx_scr,
                          *, heads, head_dim, eps):
    """One full BERT encoder layer for one batch element.

    Grid is (batch, layer). The running hidden state lives in the VMEM scratch
    `h_scr` across the layer axis; it is initialised from the embedding output
    at layer 0 and written back to HBM only after the last layer.
    """
    l = pl.program_id(1)

    @pl.when(l == 0)
    def _():
        h_scr[...] = hid_ref[0]                               # (S, H) bf16

    H = heads * head_dim
    scale = 1.0 / (head_dim ** 0.5)
    h_bf = h_scr[...]                                         # (S, H) bf16
    bias = bias_ref[0]                                        # (1, S) f32

    # ---- fused QKV projection: (S,H) @ (H,3H); qkv never leaves VMEM ----
    qkv = (jnp.dot(h_bf, qkv_w_ref[0], preferred_element_type=jnp.float32)
           + qkv_b_ref[0]).astype(jnp.bfloat16)               # (S, 3H)

    # ---- multi-head self-attention, heads sliced in-kernel ----
    # TODO(synk): at real BERT shapes use a flash/online-softmax formulation
    #             with a head-major layout (this per-head K=N=64 path wastes
    #             the 256-wide MXU on v6e/v7x).
    for hd in range(heads):                                   # static unroll (2 heads)
        q = qkv[:, hd * head_dim:(hd + 1) * head_dim]                    # (S, Dh)
        k = qkv[:, H + hd * head_dim:H + (hd + 1) * head_dim]            # (S, Dh)
        v = qkv[:, 2 * H + hd * head_dim:2 * H + (hd + 1) * head_dim]    # (S, Dh)
        s = jax.lax.dot_general(q, k, (((1,), (1,)), ((), ())),
                                preferred_element_type=jnp.float32)      # (S, S)
        s = s * scale + bias
        m = jnp.max(s, axis=-1, keepdims=True)
        p = jnp.exp(s - m)
        p = p * pl.reciprocal(jnp.sum(p, axis=-1, keepdims=True), approx=True)
        # store this head's context directly into the VMEM slab (no concat).
        ctx_scr[:, hd * head_dim:(hd + 1) * head_dim] = jnp.dot(
            p.astype(jnp.bfloat16), v,
            preferred_element_type=jnp.float32).astype(jnp.bfloat16)

    # ---- attention output projection + residual + LayerNorm (fused) ----
    attn = (jnp.dot(ctx_scr[...], o_w_ref[0], preferred_element_type=jnp.float32)
            + o_b_ref[0] + h_bf.astype(jnp.float32))
    h1 = _ln(attn, aln_g_ref[0], aln_b_ref[0], eps)           # (S, H) f32
    h1_bf = h1.astype(jnp.bfloat16)

    # ---- FFN1(GELU) + FFN2 + residual + LayerNorm fused; the (S, I)
    #      intermediate stays in VMEM/registers, never written to HBM ----
    ffn = (jnp.dot(h1_bf, w1_ref[0], preferred_element_type=jnp.float32)
           + b1_ref[0])
    # TODO(synk): HF BERT uses exact erf GELU; tanh approximation keeps a clean
    #             EUP lowering on TPU (small numeric divergence).
    ffn = jax.nn.gelu(ffn, approximate=True).astype(jnp.bfloat16)
    y = (jnp.dot(ffn, w2_ref[0], preferred_element_type=jnp.float32)
         + b2_ref[0] + h1)
    new_h = _ln(y, fln_g_ref[0], fln_b_ref[0], eps).astype(jnp.bfloat16)

    h_scr[...] = new_h

    @pl.when(l == pl.num_programs(1) - 1)
    def _():
        out_ref[0] = new_h


def _pooler_classifier_kernel(x_ref, wp_ref, bp_ref, wc_ref, bc_ref, o_ref):
    """relu(tanh(x @ Wp + bp) @ Wc_pad + bc_pad) — pooler + classifier fused."""
    pooled = jnp.tanh(
        jnp.dot(x_ref[...], wp_ref[...], preferred_element_type=jnp.float32)
        + bp_ref[...])
    # dropout between pooler and classifier is identity at inference.
    logits = jnp.dot(pooled.astype(wc_ref.dtype), wc_ref[...],
                     preferred_element_type=jnp.float32) + bc_ref[...]
    o_ref[...] = jnp.maximum(logits, 0.0).astype(o_ref.dtype)


# ----------------------------------------------------------------------------
# Wrappers (pallas_call plumbing)
# ----------------------------------------------------------------------------

def _token_tile(M, max_tile=256):
    """8-aligned token tile; keep >=2 grid steps when M allows (v7x megacore)."""
    if M <= 8:
        return max(M, 1)
    tm = min(max_tile, (M // 2 // 8) * 8)
    return max(tm, 8)


def layernorm(x, gamma, beta, eps=1e-12, out_dtype=jnp.bfloat16):
    """LayerNorm over hidden axis; cdiv grid, no pad/slice HBM copies."""
    M, H = x.shape
    tm = _token_tile(M)
    kernel = functools.partial(_layernorm_kernel, eps=eps)
    # NOTE: gamma/beta blocks are constant across grid steps; at real shapes
    # they could be single-buffered, but they are tiny here.
    return pl.pallas_call(
        kernel,
        out_shape=jax.ShapeDtypeStruct((M, H), out_dtype),
        grid=(pl.cdiv(M, tm),),
        in_specs=[
            pl.BlockSpec((tm, H), lambda i: (i, 0)),
            pl.BlockSpec((1, H), lambda i: (0, 0)),
            pl.BlockSpec((1, H), lambda i: (0, 0)),
        ],
        out_specs=pl.BlockSpec((tm, H), lambda i: (i, 0)),
        compiler_params=pltpu.CompilerParams(dimension_semantics=("parallel",)),
    )(x, gamma.reshape(1, H), beta.reshape(1, H))


def encoder_layers(hidden, bias, params, heads, head_dim, eps=1e-12):
    """Run all encoder layers in one pallas_call: grid=(batch, layers)."""
    B, S, H = hidden.shape
    L = params["qkv_w"].shape[0]
    I = params["ffn_w1"].shape[-1]
    kernel = functools.partial(_encoder_layer_kernel, heads=heads,
                               head_dim=head_dim, eps=eps)

    batch_map = lambda b, l: (b, 0, 0)   # constant over the layer axis
    layer_map = lambda b, l: (l, 0, 0)   # per-layer weights/biases/LN params

    return pl.pallas_call(
        kernel,
        out_shape=jax.ShapeDtypeStruct((B, S, H), hidden.dtype),
        grid=(B, L),
        in_specs=[
            pl.BlockSpec((1, 1, S), batch_map),         # attention mask bias
            pl.BlockSpec((1, S, H), batch_map),         # embedding output
            pl.BlockSpec((1, H, 3 * H), layer_map),     # qkv_w
            pl.BlockSpec((1, 1, 3 * H), layer_map),     # qkv_b
            pl.BlockSpec((1, H, H), layer_map),         # o_w
            pl.BlockSpec((1, 1, H), layer_map),         # o_b
            pl.BlockSpec((1, 1, H), layer_map),         # attn_ln_g
            pl.BlockSpec((1, 1, H), layer_map),         # attn_ln_b
            pl.BlockSpec((1, H, I), layer_map),         # ffn_w1
            pl.BlockSpec((1, 1, I), layer_map),         # ffn_b1
            pl.BlockSpec((1, I, H), layer_map),         # ffn_w2
            pl.BlockSpec((1, 1, H), layer_map),         # ffn_b2
            pl.BlockSpec((1, 1, H), layer_map),         # ffn_ln_g
            pl.BlockSpec((1, 1, H), layer_map),         # ffn_ln_b
        ],
        out_specs=pl.BlockSpec((1, S, H), batch_map),
        scratch_shapes=[
            pltpu.VMEM((S, H), jnp.bfloat16),           # carried hidden state
            pltpu.VMEM((S, H), jnp.bfloat16),           # attention context slab
        ],
        compiler_params=pltpu.CompilerParams(
            dimension_semantics=("parallel", "arbitrary"),
            vmem_limit_bytes=32 * 1024 * 1024),
    )(bias, hidden,
      params["qkv_w"], params["qkv_b"], params["o_w"], params["o_b"],
      params["attn_ln_g"], params["attn_ln_b"],
      params["ffn_w1"], params["ffn_b1"], params["ffn_w2"], params["ffn_b2"],
      params["ffn_ln_g"], params["ffn_ln_b"])


def pooler_classifier(x, wp, bp, wc_pad, bc_pad):
    """x:(B,H) bf16 -> relu(linear(tanh(pooler(x)))) with 128-padded classes."""
    B, H = x.shape
    Cp = wc_pad.shape[1]
    # TODO(synk): at large batch, grid over batch tiles (>=2 steps) for v7x.
    return pl.pallas_call(
        _pooler_classifier_kernel,
        out_shape=jax.ShapeDtypeStruct((B, Cp), jnp.float32),
        grid=(1,),
        in_specs=[
            pl.BlockSpec((B, H), lambda i: (0, 0)),
            pl.BlockSpec((H, H), lambda i: (0, 0)),
            pl.BlockSpec((1, H), lambda i: (0, 0)),
            pl.BlockSpec((H, Cp), lambda i: (0, 0)),
            pl.BlockSpec((1, Cp), lambda i: (0, 0)),
        ],
        out_specs=pl.BlockSpec((B, Cp), lambda i: (0, 0)),
    )(x, wp, bp.reshape(1, H), wc_pad, bc_pad.reshape(1, Cp))


# ----------------------------------------------------------------------------
# Model: parameters + forward
# ----------------------------------------------------------------------------

CFG = dict(
    vocab=100,
    max_pos=64,
    type_vocab=2,
    hidden=128,       # scaled down from BERT's 768
    heads=2,
    intermediate=256,
    layers=2,
    num_classes=8,
)


def init_params(key, cfg):
    """Deterministic synthetic parameters.

    Matmul weights are bf16 (MXU operands); biases and LayerNorm params stay
    f32. Encoder weights are stacked over layers so one pallas_call with a
    layer grid axis can index them. Q/K/V weights are pre-fused to (H, 3H);
    the classifier weight is lane-padded to 128 output columns.
    """
    def nrm(k, shape, dtype=jnp.bfloat16):
        return (0.02 * jax.random.normal(k, shape, dtype=jnp.float32)).astype(dtype)

    H, I, C, L = cfg["hidden"], cfg["intermediate"], cfg["num_classes"], cfg["layers"]
    Cp = ((C + 127) // 128) * 128
    keys = iter(jax.random.split(key, 16))

    cls_w = nrm(next(keys), (H, C))
    return {
        "word_emb": nrm(next(keys), (cfg["vocab"], H), jnp.float32),
        "pos_emb": nrm(next(keys), (cfg["max_pos"], H), jnp.float32),
        "type_emb": nrm(next(keys), (cfg["type_vocab"], H), jnp.float32),
        "emb_ln_g": jnp.ones((H,), jnp.float32),
        "emb_ln_b": jnp.zeros((H,), jnp.float32),
        "pooler_w": nrm(next(keys), (H, H)),
        "pooler_b": jnp.zeros((H,), jnp.float32),
        "cls_w_pad": jnp.zeros((H, Cp), jnp.bfloat16).at[:, :C].set(cls_w),
        "cls_b_pad": jnp.zeros((Cp,), jnp.float32),
        # ---- encoder weights, stacked over layers ----
        "qkv_w": nrm(next(keys), (L, H, 3 * H)),            # [Wq | Wk | Wv]
        "qkv_b": jnp.zeros((L, 1, 3 * H), jnp.float32),
        "o_w": nrm(next(keys), (L, H, H)),
        "o_b": jnp.zeros((L, 1, H), jnp.float32),
        "attn_ln_g": jnp.ones((L, 1, H), jnp.float32),
        "attn_ln_b": jnp.zeros((L, 1, H), jnp.float32),
        "ffn_w1": nrm(next(keys), (L, H, I)),
        "ffn_b1": jnp.zeros((L, 1, I), jnp.float32),
        "ffn_w2": nrm(next(keys), (L, I, H)),
        "ffn_b2": jnp.zeros((L, 1, H), jnp.float32),
        "ffn_ln_g": jnp.ones((L, 1, H), jnp.float32),
        "ffn_ln_b": jnp.zeros((L, 1, H), jnp.float32),
    }


def bert_classifier_forward(params, input_id, mask, cfg):
    """Mirrors BertClassifier.forward: bert(...) -> dropout -> linear -> relu."""
    B, S = input_id.shape
    H, heads = cfg["hidden"], cfg["heads"]
    Dh = H // heads
    M = B * S

    # ---- embeddings (gather + add are glue; LayerNorm is a Pallas kernel) ----
    word = jnp.take(params["word_emb"], input_id, axis=0)            # (B,S,H) f32
    pos = params["pos_emb"][:S][None, :, :]                          # (1,S,H)
    typ = params["type_emb"][0][None, None, :]                       # token_type_ids == 0
    emb = (word + pos + typ).astype(jnp.bfloat16).reshape(M, H)      # bf16 DMA
    hidden = layernorm(emb, params["emb_ln_g"], params["emb_ln_b"])  # (M,H) bf16
    hidden = hidden.reshape(B, S, H)
    # embedding / attention / hidden dropout: identity at inference.

    # ---- extended attention mask: (1 - mask) * -1e9 on key positions ----
    bias = ((1.0 - mask.astype(jnp.float32)) * -1e9)[:, None, :]     # (B,1,S)

    # ---- all transformer encoder layers in one fused pallas_call ----
    hidden = encoder_layers(hidden, bias, params, heads, Dh)         # (B,S,H) bf16

    # ---- pooler (tanh dense on first token) + dropout + linear + relu ----
    first_tok = hidden[:, 0, :]                                      # (B,H) bf16
    logits_pad = pooler_classifier(first_tok, params["pooler_w"],
                                   params["pooler_b"],
                                   params["cls_w_pad"], params["cls_b_pad"])
    return logits_pad[:, :cfg["num_classes"]]                        # (B, num_classes)


# ----------------------------------------------------------------------------
# Main
# ----------------------------------------------------------------------------

if __name__ == "__main__":
    key = jax.random.PRNGKey(0)
    pkey, ikey = jax.random.split(key)

    params = init_params(pkey, CFG)

    B, S = 2, 8
    input_id = jax.random.randint(ikey, (B, S), 0, CFG["vocab"], dtype=jnp.int32)
    mask = jnp.ones((B, S), dtype=jnp.int32)
    mask = mask.at[:, S - 2:].set(0)   # pad the last two positions

    fwd = jax.jit(functools.partial(bert_classifier_forward, cfg=CFG))
    out = fwd(params, input_id, mask)
    out = jax.block_until_ready(out)

    assert out.shape == (B, CFG["num_classes"])
    assert bool(jnp.all(out >= 0.0))   # ReLU output
    print("KERNEL_OK")
</pallas_src>

<mosaic_0001>
module attributes {stable_mosaic.version = 11 : i64} {
  func.func @_layernorm_kernel(%arg0: i32, %arg1: memref<8x128xbf16, #tpu.memory_space<vmem>>, %arg2: memref<1x128xf32, #tpu.memory_space<vmem>>, %arg3: memref<1x128xf32, #tpu.memory_space<vmem>>, %arg4: memref<8x128xbf16, #tpu.memory_space<vmem>>) attributes {dimension_semantics = [#tpu.dimension_semantics<parallel>], iteration_bounds = array<i64: 2>, scalar_prefetch = 0 : i64, scratch_operands = 0 : i64, tpu.core_type = #tpu.core_type<tc>, window_params = [{transform_indices = @transform_0, window_bounds = array<i64: 8, 128>}, {pipeline_mode = #tpu.pipeline_mode<synchronous>, transform_indices = @transform_1, window_bounds = array<i64: 1, 128>}, {pipeline_mode = #tpu.pipeline_mode<synchronous>, transform_indices = @transform_2, window_bounds = array<i64: 1, 128>}, {transform_indices = @transform_3, window_bounds = array<i64: 8, 128>}]} {
    %c0 = arith.constant 0 : index
    %c0_0 = arith.constant 0 : index
    %0 = vector.load %arg1[%c0, %c0_0] : memref<8x128xbf16, #tpu.memory_space<vmem>>, vector<8x128xbf16>
    %1 = arith.extf %0 : vector<8x128xbf16> to vector<8x128xf32>
    %c0_1 = arith.constant 0 : index
    %c0_2 = arith.constant 0 : index
    %2 = vector.load %arg2[%c0_1, %c0_2] : memref<1x128xf32, #tpu.memory_space<vmem>>, vector<1x128xf32>
    %c0_3 = arith.constant 0 : index
    %c0_4 = arith.constant 0 : index
    %3 = vector.load %arg3[%c0_3, %c0_4] : memref<1x128xf32, #tpu.memory_space<vmem>>, vector<1x128xf32>
    %cst = arith.constant dense<0.000000e+00> : vector<8xf32>
    %4 = vector.multi_reduction <add>, %1, %cst [1] : vector<8x128xf32> to vector<8xf32>
    %5 = vector.shape_cast %4 : vector<8xf32> to vector<8x1xf32>
    %cst_5 = arith.constant 1.280000e+02 : f32
    %6 = vector.broadcast %cst_5 : f32 to vector<8x1xf32>
    %7 = arith.divf %5, %6 : vector<8x1xf32>
    %8 = vector.broadcast %7 : vector<8x1xf32> to vector<8x128xf32>
    %9 = arith.subf %1, %8 : vector<8x128xf32>
    %10 = arith.mulf %9, %9 : vector<8x128xf32>
    %cst_6 = arith.constant dense<0.000000e+00> : vector<8xf32>
    %11 = vector.multi_reduction <add>, %10, %cst_6 [1] : vector<8x128xf32> to vector<8xf32>
    %12 = vector.shape_cast %11 : vector<8xf32> to vector<8x1xf32>
    %cst_7 = arith.constant 1.280000e+02 : f32
    %13 = vector.broadcast %cst_7 : f32 to vector<8x1xf32>
    %14 = arith.divf %12, %13 : vector<8x1xf32>
    %cst_8 = arith.constant 9.99999996E-13 : f32
    %15 = vector.broadcast %cst_8 : f32 to vector<8x1xf32>
    %16 = arith.addf %14, %15 : vector<8x1xf32>
    %17 = math.rsqrt %16 : vector<8x1xf32>
    %18 = vector.broadcast %17 : vector<8x1xf32> to vector<8x128xf32>
    %19 = arith.mulf %9, %18 : vector<8x128xf32>
    %20 = vector.broadcast %2 : vector<1x128xf32> to vector<8x128xf32>
    %21 = arith.mulf %19, %20 : vector<8x128xf32>
    %22 = vector.broadcast %3 : vector<1x128xf32> to vector<8x128xf32>
    %23 = arith.addf %21, %22 : vector<8x128xf32>
    %24 = arith.truncf %23 : vector<8x128xf32> to vector<8x128xbf16>
    %c0_9 = arith.constant 0 : index
    %c0_10 = arith.constant 0 : index
    %25 = vector.load %arg4[%c0_9, %c0_10] : memref<8x128xbf16, #tpu.memory_space<vmem>>, vector<8x128xbf16>
    tpu.vector_store %arg4[%c0_9, %c0_10], %24 {strides = array<i32>} : memref<8x128xbf16, #tpu.memory_space<vmem>>, vector<8x128xbf16>,
    return
  }
  func.func @transform_0(%arg0: i32) -> (i32, i32) {
    %c0_i32 = arith.constant 0 : i32
    %c0_i32_0 = arith.constant 0 : i32
    return %arg0, %c0_i32 : i32, i32
  }
  func.func @transform_1(%arg0: i32) -> (i32, i32) {
    %c0_i32 = arith.constant 0 : i32
    %c0_i32_0 = arith.constant 0 : i32
    %c0_i32_1 = arith.constant 0 : i32
    return %c0_i32, %c0_i32_0 : i32, i32
  }
  func.func @transform_2(%arg0: i32) -> (i32, i32) {
    %c0_i32 = arith.constant 0 : i32
    %c0_i32_0 = arith.constant 0 : i32
    %c0_i32_1 = arith.constant 0 : i32
    return %c0_i32, %c0_i32_0 : i32, i32
  }
  func.func @transform_3(%arg0: i32) -> (i32, i32) {
    %c0_i32 = arith.constant 0 : i32
    %c0_i32_0 = arith.constant 0 : i32
    return %arg0, %c0_i32 : i32, i32
  }
}

module attributes {stable_mosaic.version = 11 : i64} {
  func.func @_encoder_layer_kernel(%arg0: i32, %arg1: i32, %arg2: memref<1x1x8xf32, #tpu.memory_space<vmem>>, %arg3: memref<1x8x128xbf16, #tpu.memory_space<vmem>>, %arg4: memref<1x128x384xbf16, #tpu.memory_space<vmem>>, %arg5: memref<1x1x384xf32, #tpu.memory_space<vmem>>, %arg6: memref<1x128x128xbf16, #tpu.memory_space<vmem>>, %arg7: memref<1x1x128xf32, #tpu.memory_space<vmem>>, %arg8: memref<1x1x128xf32, #tpu.memory_space<vmem>>, %arg9: memref<1x1x128xf32, #tpu.memory_space<vmem>>, %arg10: memref<1x128x256xbf16, #tpu.memory_space<vmem>>, %arg11: memref<1x1x256xf32, #tpu.memory_space<vmem>>, %arg12: memref<1x256x128xbf16, #tpu.memory_space<vmem>>, %arg13: memref<1x1x128xf32, #tpu.memory_space<vmem>>, %arg14: memref<1x1x128xf32, #tpu.memory_space<vmem>>, %arg15: memref<1x1x128xf32, #tpu.memory_space<vmem>>, %arg16: memref<1x8x128xbf16, #tpu.memory_space<vmem>>, %arg17: memref<8x128xbf16, #tpu.memory_space<vmem>>, %arg18: memref<8x128xbf16, #tpu.memory_space<vmem>>) attributes {dimension_semantics = [#tpu.dimension_semantics<parallel>, #tpu.dimension_semantics<arbitrary>], iteration_bounds = array<i64: 2, 2>, scalar_prefetch = 0 : i64, scratch_operands = 2 : i64, tpu.core_type = #tpu.core_type<tc>, window_params = [{transform_indices = @transform_0, window_bounds = array<i64: 1, 1, 8>}, {transform_indices = @transform_1, window_bounds = array<i64: 1, 8, 128>}, {transform_indices = @transform_2, window_bounds = array<i64: 1, 128, 384>}, {transform_indices = @transform_3, window_bounds = array<i64: 1, 1, 384>}, {transform_indices = @transform_4, window_bounds = array<i64: 1, 128, 128>}, {transform_indices = @transform_5, window_bounds = array<i64: 1, 1, 128>}, {transform_indices = @transform_6, window_bounds = array<i64: 1, 1, 128>}, {transform_indices = @transform_7, window_bounds = array<i64: 1, 1, 128>}, {transform_indices = @transform_8, window_bounds = array<i64: 1, 128, 256>}, {transform_indices = @transform_9, window_bounds = array<i64: 1, 1, 256>}, {transform_indices = @transform_10, window_bounds = array<i64: 1, 256, 128>}, {transform_indices = @transform_11, window_bounds = array<i64: 1, 1, 128>}, {transform_indices = @transform_12, window_bounds = array<i64: 1, 1, 128>}, {transform_indices = @transform_13, window_bounds = array<i64: 1, 1, 128>}, {transform_indices = @transform_14, window_bounds = array<i64: 1, 8, 128>}]} {
    %c0_i32 = arith.constant 0 : i32
    %0 = arith.cmpi eq, %arg1, %c0_i32 : i32
    %1 = arith.extui %0 : i1 to i32
    %c0_i32_0 = arith.constant 0 : i32
    %2 = arith.cmpi ne, %1, %c0_i32_0 : i32
    scf.if %2 {
      %c0_76 = arith.constant 0 : index
      %c0_77 = arith.constant 0 : index
      %c0_78 = arith.constant 0 : index
      %151 = vector.load %arg3[%c0_76, %c0_77, %c0_78] : memref<1x8x128xbf16, #tpu.memory_space<vmem>>, vector<1x8x128xbf16>
      %152 = vector.shape_cast %151 : vector<1x8x128xbf16> to vector<8x128xbf16>
      %c0_79 = arith.constant 0 : index
      %c0_80 = arith.constant 0 : index
      %153 = vector.load %arg17[%c0_79, %c0_80] : memref<8x128xbf16, #tpu.memory_space<vmem>>, vector<8x128xbf16>
      tpu.vector_store %arg17[%c0_79, %c0_80], %152 {strides = array<i32>} : memref<8x128xbf16, #tpu.memory_space<vmem>>, vector<8x128xbf16>,
    } else {
    }
    %c0 = arith.constant 0 : index
    %c0_1 = arith.constant 0 : index
    %3 = vector.load %arg17[%c0, %c0_1] : memref<8x128xbf16, #tpu.memory_space<vmem>>, vector<8x128xbf16>
    %c0_2 = arith.constant 0 : index
    %c0_3 = arith.constant 0 : index
    %c0_4 = arith.constant 0 : index
    %4 = vector.load %arg2[%c0_2, %c0_3, %c0_4] : memref<1x1x8xf32, #tpu.memory_space<vmem>>, vector<1x1x8xf32>
    %5 = vector.shape_cast %4 : vector<1x1x8xf32> to vector<1x8xf32>
    %c0_5 = arith.constant 0 : index
    %c0_6 = arith.constant 0 : index
    %c0_7 = arith.constant 0 : index
    %6 = vector.load %arg4[%c0_5, %c0_6, %c0_7] : memref<1x128x384xbf16, #tpu.memory_space<vmem>>, vector<1x128x384xbf16>
    %7 = vector.shape_cast %6 : vector<1x128x384xbf16> to vector<128x384xbf16>
    %cst = arith.constant dense<0.000000e+00> : vector<8x384xf32>
    %8 = tpu.matmul %3, %7, %cst {dimension_numbers = #tpu.dot_dimension_numbers<[1], [0], [0], [1], [0, 0, 1, 1], [], []>} : vector<8x128xbf16>, vector<128x384xbf16>, vector<8x384xf32> -> vector<8x384xf32>
    %c0_8 = arith.constant 0 : index
    %c0_9 = arith.constant 0 : index
    %c0_10 = arith.constant 0 : index
    %9 = vector.load %arg5[%c0_8, %c0_9, %c0_10] : memref<1x1x384xf32, #tpu.memory_space<vmem>>, vector<1x1x384xf32>
    %10 = vector.shape_cast %9 : vector<1x1x384xf32> to vector<1x384xf32>
    %11 = vector.broadcast %10 : vector<1x384xf32> to vector<8x384xf32>
    %12 = arith.addf %8, %11 : vector<8x384xf32>
    %13 = arith.truncf %12 : vector<8x384xf32> to vector<8x384xbf16>
    %14 = vector.extract_strided_slice %13 {offsets = [0, 0], sizes = [8, 64], strides = [1, 1]} : vector<8x384xbf16> to vector<8x64xbf16>
    %15 = vector.extract_strided_slice %13 {offsets = [0, 128], sizes = [8, 64], strides = [1, 1]} : vector<8x384xbf16> to vector<8x64xbf16>
    %16 = vector.extract_strided_slice %13 {offsets = [0, 256], sizes = [8, 64], strides = [1, 1]} : vector<8x384xbf16> to vector<8x64xbf16>
    %cst_11 = arith.constant dense<0.000000e+00> : vector<8x8xf32>
    %17 = tpu.matmul %14, %15, %cst_11 {dimension_numbers = #tpu.dot_dimension_numbers<[1], [1], [0], [0], [0, 0, 1, 0], [], []>} : vector<8x64xbf16>, vector<8x64xbf16>, vector<8x8xf32> -> vector<8x8xf32>
    %cst_12 = arith.constant 1.250000e-01 : f32
    %18 = vector.broadcast %cst_12 : f32 to vector<8x8xf32>
    %19 = arith.mulf %17, %18 : vector<8x8xf32>
    %20 = vector.broadcast %5 : vector<1x8xf32> to vector<8x8xf32>
    %21 = arith.addf %19, %20 : vector<8x8xf32>
    %cst_13 = arith.constant dense<0xFF800000> : vector<8xf32>
    %22 = vector.multi_reduction <maximumf>, %21, %cst_13 [1] : vector<8x8xf32> to vector<8xf32>
    %23 = vector.shape_cast %22 : vector<8xf32> to vector<8x1xf32>
    %24 = vector.broadcast %23 : vector<8x1xf32> to vector<8x8xf32>
    %25 = arith.subf %21, %24 : vector<8x8xf32>
    %26 = math.exp %25 : vector<8x8xf32>
    %cst_14 = arith.constant dense<0.000000e+00> : vector<8xf32>
    %27 = vector.multi_reduction <add>, %26, %cst_14 [1] : vector<8x8xf32> to vector<8xf32>
    %28 = vector.shape_cast %27 : vector<8xf32> to vector<8x1xf32>
    %29 = tpu.reciprocal %28 {approx = true} : vector<8x1xf32> -> vector<8x1xf32>
    %30 = vector.broadcast %29 : vector<8x1xf32> to vector<8x8xf32>
    %31 = arith.mulf %26, %30 : vector<8x8xf32>
    %32 = arith.truncf %31 : vector<8x8xf32> to vector<8x8xbf16>
    %cst_15 = arith.constant dense<0.000000e+00> : vector<8x64xf32>
    %33 = tpu.matmul %32, %16, %cst_15 {dimension_numbers = #tpu.dot_dimension_numbers<[1], [0], [0], [1], [0, 0, 1, 1], [], []>} : vector<8x8xbf16>, vector<8x64xbf16>, vector<8x64xf32> -> vector<8x64xf32>
    %34 = arith.truncf %33 : vector<8x64xf32> to vector<8x64xbf16>
    %c0_16 = arith.constant 0 : index
    %c0_17 = arith.constant 0 : index
    %35 = vector.load %arg18[%c0_16, %c0_17] : memref<8x128xbf16, #tpu.memory_space<vmem>>, vector<8x64xbf16>
    tpu.vector_store %arg18[%c0_16, %c0_17], %34 {strides = array<i32>} : memref<8x128xbf16, #tpu.memory_space<vmem>>, vector<8x64xbf16>,
    %36 = vector.extract_strided_slice %13 {offsets = [0, 64], sizes = [8, 64], strides = [1, 1]} : vector<8x384xbf16> to vector<8x64xbf16>
    %37 = vector.extract_strided_slice %13 {offsets = [0, 192], sizes = [8, 64], strides = [1, 1]} : vector<8x384xbf16> to vector<8x64xbf16>
    %38 = vector.extract_strided_slice %13 {offsets = [0, 320], sizes = [8, 64], strides = [1, 1]} : vector<8x384xbf16> to vector<8x64xbf16>
    %cst_18 = arith.constant dense<0.000000e+00> : vector<8x8xf32>
    %39 = tpu.matmul %36, %37, %cst_18 {dimension_numbers = #tpu.dot_dimension_numbers<[1], [1], [0], [0], [0, 0, 1, 0], [], []>} : vector<8x64xbf16>, vector<8x64xbf16>, vector<8x8xf32> -> vector<8x8xf32>
    %cst_19 = arith.constant 1.250000e-01 : f32
    %40 = vector.broadcast %cst_19 : f32 to vector<8x8xf32>
    %41 = arith.mulf %39, %40 : vector<8x8xf32>
    %42 = vector.broadcast %5 : vector<1x8xf32> to vector<8x8xf32>
    %43 = arith.addf %41, %42 : vector<8x8xf32>
    %cst_20 = arith.constant dense<0xFF800000> : vector<8xf32>
    %44 = vector.multi_reduction <maximumf>, %43, %cst_20 [1] : vector<8x8xf32> to vector<8xf32>
    %45 = vector.shape_cast %44 : vector<8xf32> to vector<8x1xf32>
    %46 = vector.broadcast %45 : vector<8x1xf32> to vector<8x8xf32>
    %47 = arith.subf %43, %46 : vector<8x8xf32>
    %48 = math.exp %47 : vector<8x8xf32>
    %cst_21 = arith.constant dense<0.000000e+00> : vector<8xf32>
    %49 = vector.multi_reduction <add>, %48, %cst_21 [1] : vector<8x8xf32> to vector<8xf32>
    %50 = vector.shape_cast %49 : vector<8xf32> to vector<8x1xf32>
    %51 = tpu.reciprocal %50 {approx = true} : vector<8x1xf32> -> vector<8x1xf32>
    %52 = vector.broadcast %51 : vector<8x1xf32> to vector<8x8xf32>
    %53 = arith.mulf %48, %52 : vector<8x8xf32>
    %54 = arith.truncf %53 : vector<8x8xf32> to vector<8x8xbf16>
    %cst_22 = arith.constant dense<0.000000e+00> : vector<8x64xf32>
    %55 = tpu.matmul %54, %38, %cst_22 {dimension_numbers = #tpu.dot_dimension_numbers<[1], [0], [0], [1], [0, 0, 1, 1], [], []>} : vector<8x8xbf16>, vector<8x64xbf16>, vector<8x64xf32> -> vector<8x64xf32>
    %56 = arith.truncf %55 : vector<8x64xf32> to vector<8x64xbf16>
    %c0_23 = arith.constant 0 : index
    %c64 = arith.constant 64 : index
    %57 = vector.load %arg18[%c0_23, %c64] : memref<8x128xbf16, #tpu.memory_space<vmem>>, vector<8x64xbf16>
    tpu.vector_store %arg18[%c0_23, %c64], %56 {strides = array<i32>} : memref<8x128xbf16, #tpu.memory_space<vmem>>, vector<8x64xbf16>,
    %c0_24 = arith.constant 0 : index
    %c0_25 = arith.constant 0 : index
    %58 = vector.load %arg18[%c0_24, %c0_25] : memref<8x128xbf16, #tpu.memory_space<vmem>>, vector<8x128xbf16>
    %c0_26 = arith.constant 0 : index
    %c0_27 = arith.constant 0 : index
    %c0_28 = arith.constant 0 : index
    %59 = vector.load %arg6[%c0_26, %c0_27, %c0_28] : memref<1x128x128xbf16, #tpu.memory_space<vmem>>, vector<1x128x128xbf16>
    %60 = vector.shape_cast %59 : vector<1x128x128xbf16> to vector<128x128xbf16>
    %cst_29 = arith.constant dense<0.000000e+00> : vector<8x128xf32>
    %61 = tpu.matmul %58, %60, %cst_29 {dimension_numbers = #tpu.dot_dimension_numbers<[1], [0], [0], [1], [0, 0, 1, 1], [], []>} : vector<8x128xbf16>, vector<128x128xbf16>, vector<8x128xf32> -> vector<8x128xf32>
    %c0_30 = arith.constant 0 : index
    %c0_31 = arith.constant 0 : index
    %c0_32 = arith.constant 0 : index
    %62 = vector.load %arg7[%c0_30, %c0_31, %c0_32] : memref<1x1x128xf32, #tpu.memory_space<vmem>>, vector<1x1x128xf32>
    %63 = vector.shape_cast %62 : vector<1x1x128xf32> to vector<1x128xf32>
    %64 = vector.broadcast %63 : vector<1x128xf32> to vector<8x128xf32>
    %65 = arith.addf %61, %64 : vector<8x128xf32>
    %66 = arith.extf %3 : vector<8x128xbf16> to vector<8x128xf32>
    %67 = arith.addf %65, %66 : vector<8x128xf32>
    %c0_33 = arith.constant 0 : index
    %c0_34 = arith.constant 0 : index
    %c0_35 = arith.constant 0 : index
    %68 = vector.load %arg8[%c0_33, %c0_34, %c0_35] : memref<1x1x128xf32, #tpu.memory_space<vmem>>, vector<1x1x128xf32>
    %69 = vector.shape_cast %68 : vector<1x1x128xf32> to vector<1x128xf32>
    %c0_36 = arith.constant 0 : index
    %c0_37 = arith.constant 0 : index
    %c0_38 = arith.constant 0 : index
    %70 = vector.load %arg9[%c0_36, %c0_37, %c0_38] : memref<1x1x128xf32, #tpu.memory_space<vmem>>, vector<1x1x128xf32>
    %71 = vector.shape_cast %70 : vector<1x1x128xf32> to vector<1x128xf32>
    %cst_39 = arith.constant dense<0.000000e+00> : vector<8xf32>
    %72 = vector.multi_reduction <add>, %67, %cst_39 [1] : vector<8x128xf32> to vector<8xf32>
    %73 = vector.shape_cast %72 : vector<8xf32> to vector<8x1xf32>
    %cst_40 = arith.constant 1.280000e+02 : f32
    %74 = vector.broadcast %cst_40 : f32 to vector<8x1xf32>
    %75 = arith.divf %73, %74 : vector<8x1xf32>
    %76 = vector.broadcast %75 : vector<8x1xf32> to vector<8x128xf32>
    %77 = arith.subf %67, %76 : vector<8x128xf32>
    %78 = arith.mulf %77, %77 : vector<8x128xf32>
    %cst_41 = arith.constant dense<0.000000e+00> : vector<8xf32>
    %79 = vector.multi_reduction <add>, %78, %cst_41 [1] : vector<8x128xf32> to vector<8xf32>
    %80 = vector.shape_cast %79 : vector<8xf32> to vector<8x1xf32>
    %cst_42 = arith.constant 1.280000e+02 : f32
    %81 = vector.broadcast %cst_42 : f32 to vector<8x1xf32>
    %82 = arith.divf %80, %81 : vector<8x1xf32>
    %cst_43 = arith.constant 9.99999996E-13 : f32
    %83 = vector.broadcast %cst_43 : f32 to vector<8x1xf32>
    %84 = arith.addf %82, %83 : vector<8x1xf32>
    %85 = math.rsqrt %84 : vector<8x1xf32>
    %86 = vector.broadcast %85 : vector<8x1xf32> to vector<8x128xf32>
    %87 = arith.mulf %77, %86 : vector<8x128xf32>
    %88 = vector.broadcast %69 : vector<1x128xf32> to vector<8x128xf32>
    %89 = arith.mulf %87, %88 : vector<8x128xf32>
    %90 = vector.broadcast %71 : vector<1x128xf32> to vector<8x128xf32>
    %91 = arith.addf %89, %90 : vector<8x128xf32>
    %92 = arith.truncf %91 : vector<8x128xf32> to vector<8x128xbf16>
    %c0_44 = arith.constant 0 : index
    %c0_45 = arith.constant 0 : index
    %c0_46 = arith.constant 0 : index
    %93 = vector.load %arg10[%c0_44, %c0_45, %c0_46] : memref<1x128x256xbf16, #tpu.memory_space<vmem>>, vector<1x128x256xbf16>
    %94 = vector.shape_cast %93 : vector<1x128x256xbf16> to vector<128x256xbf16>
    %cst_47 = arith.constant dense<0.000000e+00> : vector<8x256xf32>
    %95 = tpu.matmul %92, %94, %cst_47 {dimension_numbers = #tpu.dot_dimension_numbers<[1], [0], [0], [1], [0, 0, 1, 1], [], []>} : vector<8x128xbf16>, vector<128x256xbf16>, vector<8x256xf32> -> vector<8x256xf32>
    %c0_48 = arith.constant 0 : index
    %c0_49 = arith.constant 0 : index
    %c0_50 = arith.constant 0 : index
    %96 = vector.load %arg11[%c0_48, %c0_49, %c0_50] : memref<1x1x256xf32, #tpu.memory_space<vmem>>, vector<1x1x256xf32>
    %97 = vector.shape_cast %96 : vector<1x1x256xf32> to vector<1x256xf32>
    %98 = vector.broadcast %97 : vector<1x256xf32> to vector<8x256xf32>
    %99 = arith.addf %95, %98 : vector<8x256xf32>
    %100 = arith.mulf %99, %99 : vector<8x256xf32>
    %101 = arith.mulf %99, %100 : vector<8x256xf32>
    %cst_51 = arith.constant 4.471500e-02 : f32
    %102 = vector.broadcast %cst_51 : f32 to vector<8x256xf32>
    %103 = arith.mulf %102, %101 : vector<8x256xf32>
    %104 = arith.addf %99, %103 : vector<8x256xf32>
    %cst_52 = arith.constant 0.797884583 : f32
    %105 = vector.broadcast %cst_52 : f32 to vector<8x256xf32>
    %106 = arith.mulf %105, %104 : vector<8x256xf32>
    %107 = math.tanh %106 : vector<8x256xf32>
    %cst_53 = arith.constant 1.000000e+00 : f32
    %108 = vector.broadcast %cst_53 : f32 to vector<8x256xf32>
    %109 = arith.addf %108, %107 : vector<8x256xf32>
    %cst_54 = arith.constant 5.000000e-01 : f32
    %110 = vector.broadcast %cst_54 : f32 to vector<8x256xf32>
    %111 = arith.mulf %110, %109 : vector<8x256xf32>
    %112 = arith.mulf %99, %111 : vector<8x256xf32>
    %113 = arith.truncf %112 : vector<8x256xf32> to vector<8x256xbf16>
    %c0_55 = arith.constant 0 : index
    %c0_56 = arith.constant 0 : index
    %c0_57 = arith.constant 0 : index
    %114 = vector.load %arg12[%c0_55, %c0_56, %c0_57] : memref<1x256x128xbf16, #tpu.memory_space<vmem>>, vector<1x256x128xbf16>
    %115 = vector.shape_cast %114 : vector<1x256x128xbf16> to vector<256x128xbf16>
    %cst_58 = arith.constant dense<0.000000e+00> : vector<8x128xf32>
    %116 = tpu.matmul %113, %115, %cst_58 {dimension_numbers = #tpu.dot_dimension_numbers<[1], [0], [0], [1], [0, 0, 1, 1], [], []>} : vector<8x256xbf16>, vector<256x128xbf16>, vector<8x128xf32> -> vector<8x128xf32>
    %c0_59 = arith.constant 0 : index
    %c0_60 = arith.constant 0 : index
    %c0_61 = arith.constant 0 : index
    %117 = vector.load %arg13[%c0_59, %c0_60, %c0_61] : memref<1x1x128xf32, #tpu.memory_space<vmem>>, vector<1x1x128xf32>
    %118 = vector.shape_cast %117 : vector<1x1x128xf32> to vector<1x128xf32>
    %119 = vector.broadcast %118 : vector<1x128xf32> to vector<8x128xf32>
    %120 = arith.addf %116, %119 : vector<8x128xf32>
    %121 = arith.addf %120, %91 : vector<8x128xf32>
    %c0_62 = arith.constant 0 : index
    %c0_63 = arith.constant 0 : index
    %c0_64 = arith.constant 0 : index
    %122 = vector.load %arg14[%c0_62, %c0_63, %c0_64] : memref<1x1x128xf32, #tpu.memory_space<vmem>>, vector<1x1x128xf32>
    %123 = vector.shape_cast %122 : vector<1x1x128xf32> to vector<1x128xf32>
    %c0_65 = arith.constant 0 : index
    %c0_66 = arith.constant 0 : index
    %c0_67 = arith.constant 0 : index
    %124 = vector.load %arg15[%c0_65, %c0_66, %c0_67] : memref<1x1x128xf32, #tpu.memory_space<vmem>>, vector<1x1x128xf32>
    %125 = vector.shape_cast %124 : vector<1x1x128xf32> to vector<1x128xf32>
    %cst_68 = arith.constant dense<0.000000e+00> : vector<8xf32>
    %126 = vector.multi_reduction <add>, %121, %cst_68 [1] : vector<8x128xf32> to vector<8xf32>
    %127 = vector.shape_cast %126 : vector<8xf32> to vector<8x1xf32>
    %cst_69 = arith.constant 1.280000e+02 : f32
    %128 = vector.broadcast %cst_69 : f32 to vector<8x1xf32>
    %129 = arith.divf %127, %128 : vector<8x1xf32>
    %130 = vector.broadcast %129 : vector<8x1xf32> to vector<8x128xf32>
    %131 = arith.subf %121, %130 : vector<8x128xf32>
    %132 = arith.mulf %131, %131 : vector<8x128xf32>
    %cst_70 = arith.constant dense<0.000000e+00> : vector<8xf32>
    %133 = vector.multi_reduction <add>, %132, %cst_70 [1] : vector<8x128xf32> to vector<8xf32>
    %134 = vector.shape_cast %133 : vector<8xf32> to vector<8x1xf32>
    %cst_71 = arith.constant 1.280000e+02 : f32
    %135 = vector.broadcast %cst_71 : f32 to vector<8x1xf32>
    %136 = arith.divf %134, %135 : vector<8x1xf32>
    %cst_72 = arith.constant 9.99999996E-13 : f32
    %137 = vector.broadcast %cst_72 : f32 to vector<8x1xf32>
    %138 = arith.addf %136, %137 : vector<8x1xf32>
    %139 = math.rsqrt %138 : vector<8x1xf32>
    %140 = vector.broadcast %139 : vector<8x1xf32> to vector<8x128xf32>
    %141 = arith.mulf %131, %140 : vector<8x128xf32>
    %142 = vector.broadcast %123 : vector<1x128xf32> to vector<8x128xf32>
    %143 = arith.mulf %141, %142 : vector<8x128xf32>
    %144 = vector.broadcast %125 : vector<1x128xf32> to vector<8x128xf32>
    %145 = arith.addf %143, %144 : vector<8x128xf32>
    %146 = arith.truncf %145 : vector<8x128xf32> to vector<8x128xbf16>
    %c0_73 = arith.constant 0 : index
    %c0_74 = arith.constant 0 : index
    %147 = vector.load %arg17[%c0_73, %c0_74] : memref<8x128xbf16, #tpu.memory_space<vmem>>, vector<8x128xbf16>
    tpu.vector_store %arg17[%c0_73, %c0_74], %146 {strides = array<i32>} : memref<8x128xbf16, #tpu.memory_space<vmem>>, vector<8x128xbf16>,
    %c1_i32 = arith.constant 1 : i32
    %148 = arith.cmpi eq, %arg1, %c1_i32 : i32
    %149 = arith.extui %148 : i1 to i32
    %c0_i32_75 = arith.constant 0 : i32
    %150 = arith.cmpi ne, %149, %c0_i32_75 : i32
    scf.if %150 {
      %c0_76 = arith.constant 0 : index
      %c0_77 = arith.constant 0 : index
      %c0_78 = arith.constant 0 : index
      %151 = vector.load %arg16[%c0_76, %c0_77, %c0_78] : memref<1x8x128xbf16, #tpu.memory_space<vmem>>, vector<1x8x128xbf16>
      %152 = vector.shape_cast %151 : vector<1x8x128xbf16> to vector<8x128xbf16>
      %153 = vector.shape_cast %146 : vector<8x128xbf16> to vector<1x8x128xbf16>
      tpu.vector_store %arg16[%c0_76, %c0_77, %c0_78], %153 {strides = array<i32>} : memref<1x8x128xbf16, #tpu.memory_space<vmem>>, vector<1x8x128xbf16>,
    } else {
    }
    return
  }
  func.func @transform_0(%arg0: i32, %arg1: i32) -> (i32, i32, i32) {
    %c0_i32 = arith.constant 0 : i32
    %c0_i32_0 = arith.constant 0 : i32
    %c0_i32_1 = arith.constant 0 : i32
    return %arg0, %c0_i32, %c0_i32_0 : i32, i32, i32
  }
  func.func @transform_1(%arg0: i32, %arg1: i32) -> (i32, i32, i32) {
    %c0_i32 = arith.constant 0 : i32
    %c0_i32_0 = arith.constant 0 : i32
    %c0_i32_1 = arith.constant 0 : i32
    return %arg0, %c0_i32, %c0_i32_0 : i32, i32, i32
  }
  func.func @transform_2(%arg0: i32, %arg1: i32) -> (i32, i32, i32) {
    %c0_i32 = arith.constant 0 : i32
    %c0_i32_0 = arith.constant 0 : i32
    %c0_i32_1 = arith.constant 0 : i32
    return %arg1, %c0_i32, %c0_i32_0 : i32, i32, i32
  }
  func.func @transform_3(%arg0: i32, %arg1: i32) -> (i32, i32, i32) {
    %c0_i32 = arith.constant 0 : i32
    %c0_i32_0 = arith.constant 0 : i32
    %c0_i32_1 = arith.constant 0 : i32
    return %arg1, %c0_i32, %c0_i32_0 : i32, i32, i32
  }
  func.func @transform_4(%arg0: i32, %arg1: i32) -> (i32, i32, i32) {
    %c0_i32 = arith.constant 0 : i32
    %c0_i32_0 = arith.constant 0 : i32
    %c0_i32_1 = arith.constant 0 : i32
    return %arg1, %c0_i32, %c0_i32_0 : i32, i32, i32
  }
  func.func @transform_5(%arg0: i32, %arg1: i32) -> (i32, i32, i32) {
    %c0_i32 = arith.constant 0 : i32
    %c0_i32_0 = arith.constant 0 : i32
    %c0_i32_1 = arith.constant 0 : i32
    return %arg1, %c0_i32, %c0_i32_0 : i32, i32, i32
  }
  func.func @transform_6(%arg0: i32, %arg1: i32) -> (i32, i32, i32) {
    %c0_i32 = arith.constant 0 : i32
    %c0_i32_0 = arith.constant 0 : i32
    %c0_i32_1 = arith.constant 0 : i32
    return %arg1, %c0_i32, %c0_i32_0 : i32, i32, i32
  }
  func.func @transform_7(%arg0: i32, %arg1: i32) -> (i32, i32, i32) {
    %c0_i32 = arith.constant 0 : i32
    %c0_i32_0 = arith.constant 0 : i32
    %c0_i32_1 = arith.constant 0 : i32
    return %arg1, %c0_i32, %c0_i32_0 : i32, i32, i32
  }
  func.func @transform_8(%arg0: i32, %arg1: i32) -> (i32, i32, i32) {
    %c0_i32 = arith.constant 0 : i32
    %c0_i32_0 = arith.constant 0 : i32
    %c0_i32_1 = arith.constant 0 : i32
    return %arg1, %c0_i32, %c0_i32_0 : i32, i32, i32
  }
  func.func @transform_9(%arg0: i32, %arg1: i32) -> (i32, i32, i32) {
    %c0_i32 = arith.constant 0 : i32
    %c0_i32_0 = arith.constant 0 : i32
    %c0_i32_1 = arith.constant 0 : i32
    return %arg1, %c0_i32, %c0_i32_0 : i32, i32, i32
  }
  func.func @transform_10(%arg0: i32, %arg1: i32) -> (i32, i32, i32) {
    %c0_i32 = arith.constant 0 : i32
    %c0_i32_0 = arith.constant 0 : i32
    %c0_i32_1 = arith.constant 0 : i32
    return %arg1, %c0_i32, %c0_i32_0 : i32, i32, i32
  }
  func.func @transform_11(%arg0: i32, %arg1: i32) -> (i32, i32, i32) {
    %c0_i32 = arith.constant 0 : i32
    %c0_i32_0 = arith.constant 0 : i32
    %c0_i32_1 = arith.constant 0 : i32
    return %arg1, %c0_i32, %c0_i32_0 : i32, i32, i32
  }
  func.func @transform_12(%arg0: i32, %arg1: i32) -> (i32, i32, i32) {
    %c0_i32 = arith.constant 0 : i32
    %c0_i32_0 = arith.constant 0 : i32
    %c0_i32_1 = arith.constant 0 : i32
    return %arg1, %c0_i32, %c0_i32_0 : i32, i32, i32
  }
  func.func @transform_13(%arg0: i32, %arg1: i32) -> (i32, i32, i32) {
    %c0_i32 = arith.constant 0 : i32
    %c0_i32_0 = arith.constant 0 : i32
    %c0_i32_1 = arith.constant 0 : i32
    return %arg1, %c0_i32, %c0_i32_0 : i32, i32, i32
  }
  func.func @transform_14(%arg0: i32, %arg1: i32) -> (i32, i32, i32) {
    %c0_i32 = arith.constant 0 : i32
    %c0_i32_0 = arith.constant 0 : i32
    %c0_i32_1 = arith.constant 0 : i32
    return %arg0, %c0_i32, %c0_i32_0 : i32, i32, i32
  }
}

module attributes {stable_mosaic.version = 11 : i64} {
  func.func @_pooler_classifier_kernel(%arg0: i32, %arg1: memref<2x128xbf16, #tpu.memory_space<vmem>>, %arg2: memref<128x128xbf16, #tpu.memory_space<vmem>>, %arg3: memref<1x128xf32, #tpu.memory_space<vmem>>, %arg4: memref<128x128xbf16, #tpu.memory_space<vmem>>, %arg5: memref<1x128xf32, #tpu.memory_space<vmem>>, %arg6: memref<2x128xf32, #tpu.memory_space<vmem>>) attributes {dimension_semantics = [#tpu.dimension_semantics<arbitrary>], iteration_bounds = array<i64: 1>, scalar_prefetch = 0 : i64, scratch_operands = 0 : i64, tpu.core_type = #tpu.core_type<tc>, window_params = [{pipeline_mode = #tpu.pipeline_mode<synchronous>, transform_indices = @transform_0, window_bounds = array<i64: 2, 128>}, {pipeline_mode = #tpu.pipeline_mode<synchronous>, transform_indices = @transform_1, window_bounds = array<i64: 128, 128>}, {pipeline_mode = #tpu.pipeline_mode<synchronous>, transform_indices = @transform_2, window_bounds = array<i64: 1, 128>}, {pipeline_mode = #tpu.pipeline_mode<synchronous>, transform_indices = @transform_3, window_bounds = array<i64: 128, 128>}, {pipeline_mode = #tpu.pipeline_mode<synchronous>, transform_indices = @transform_4, window_bounds = array<i64: 1, 128>}, {pipeline_mode = #tpu.pipeline_mode<synchronous>, transform_indices = @transform_5, window_bounds = array<i64: 2, 128>}]} {
    %c0 = arith.constant 0 : index
    %c0_0 = arith.constant 0 : index
    %0 = vector.load %arg1[%c0, %c0_0] : memref<2x128xbf16, #tpu.memory_space<vmem>>, vector<2x128xbf16>
    %c0_1 = arith.constant 0 : index
    %c0_2 = arith.constant 0 : index
    %1 = vector.load %arg2[%c0_1, %c0_2] : memref<128x128xbf16, #tpu.memory_space<vmem>>, vector<128x128xbf16>
    %cst = arith.constant dense<0.000000e+00> : vector<2x128xf32>
    %2 = tpu.matmul %0, %1, %cst {dimension_numbers = #tpu.dot_dimension_numbers<[1], [0], [0], [1], [0, 0, 1, 1], [], []>} : vector<2x128xbf16>, vector<128x128xbf16>, vector<2x128xf32> -> vector<2x128xf32>
    %c0_3 = arith.constant 0 : index
    %c0_4 = arith.constant 0 : index
    %3 = vector.load %arg3[%c0_3, %c0_4] : memref<1x128xf32, #tpu.memory_space<vmem>>, vector<1x128xf32>
    %4 = vector.broadcast %3 : vector<1x128xf32> to vector<2x128xf32>
    %5 = arith.addf %2, %4 : vector<2x128xf32>
    %6 = math.tanh %5 : vector<2x128xf32>
    %7 = arith.truncf %6 : vector<2x128xf32> to vector<2x128xbf16>
    %c0_5 = arith.constant 0 : index
    %c0_6 = arith.constant 0 : index
    %8 = vector.load %arg4[%c0_5, %c0_6] : memref<128x128xbf16, #tpu.memory_space<vmem>>, vector<128x128xbf16>
    %cst_7 = arith.constant dense<0.000000e+00> : vector<2x128xf32>
    %9 = tpu.matmul %7, %8, %cst_7 {dimension_numbers = #tpu.dot_dimension_numbers<[1], [0], [0], [1], [0, 0, 1, 1], [], []>} : vector<2x128xbf16>, vector<128x128xbf16>, vector<2x128xf32> -> vector<2x128xf32>
    %c0_8 = arith.constant 0 : index
    %c0_9 = arith.constant 0 : index
    %10 = vector.load %arg5[%c0_8, %c0_9] : memref<1x128xf32, #tpu.memory_space<vmem>>, vector<1x128xf32>
    %11 = vector.broadcast %10 : vector<1x128xf32> to vector<2x128xf32>
    %12 = arith.addf %9, %11 : vector<2x128xf32>
    %cst_10 = arith.constant 0.000000e+00 : f32
    %13 = vector.broadcast %cst_10 : f32 to vector<2x128xf32>
    %14 = arith.maximumf %12, %13 : vector<2x128xf32>
    %c0_11 = arith.constant 0 : index
    %c0_12 = arith.constant 0 : index
    %15 = vector.load %arg6[%c0_11, %c0_12] : memref<2x128xf32, #tpu.memory_space<vmem>>, vector<2x128xf32>
    tpu.vector_store %arg6[%c0_11, %c0_12], %14 {strides = array<i32>} : memref<2x128xf32, #tpu.memory_space<vmem>>, vector<2x128xf32>,
    return
  }
  func.func @transform_0(%arg0: i32) -> (i32, i32) {
    %c0_i32 = arith.constant 0 : i32
    %c0_i32_0 = arith.constant 0 : i32
    %c0_i32_1 = arith.constant 0 : i32
    return %c0_i32, %c0_i32_0 : i32, i32
  }
  func.func @transform_1(%arg0: i32) -> (i32, i32) {
    %c0_i32 = arith.constant 0 : i32
    %c0_i32_0 = arith.constant 0 : i32
    %c0_i32_1 = arith.constant 0 : i32
    return %c0_i32, %c0_i32_0 : i32, i32
  }
  func.func @transform_2(%arg0: i32) -> (i32, i32) {
    %c0_i32 = arith.constant 0 : i32
    %c0_i32_0 = arith.constant 0 : i32
    %c0_i32_1 = arith.constant 0 : i32
    return %c0_i32, %c0_i32_0 : i32, i32
  }
  func.func @transform_3(%arg0: i32) -> (i32, i32) {
    %c0_i32 = arith.constant 0 : i32
    %c0_i32_0 = arith.constant 0 : i32
    %c0_i32_1 = arith.constant 0 : i32
    return %c0_i32, %c0_i32_0 : i32, i32
  }
  func.func @transform_4(%arg0: i32) -> (i32, i32) {
    %c0_i32 = arith.constant 0 : i32
    %c0_i32_0 = arith.constant 0 : i32
    %c0_i32_1 = arith.constant 0 : i32
    return %c0_i32, %c0_i32_0 : i32, i32
  }
  func.func @transform_5(%arg0: i32) -> (i32, i32) {
    %c0_i32 = arith.constant 0 : i32
    %c0_i32_0 = arith.constant 0 : i32
    %c0_i32_1 = arith.constant 0 : i32
    return %c0_i32, %c0_i32_0 : i32, i32
  }
}

</mosaic_0001>

<bundles_post_ra>
// kernel: bert_classifier_forward.3
= control target key start
LH: loop header
LB: loop body
LE: loop exit
PB: predicated region body
PF: predicated region fallthrough
CT: control target
= control target key end

     0   :  { %s300_s12 = smov 0   ;;  %s323_s0 = inlined_call_operand.vmem [shape: bf16[16,128], index: 0, kind: input, shape index: {}]   ;;  %s324_s1 = inlined_call_operand.vmem [shape: f32[1,128], index: 1, kind: input, shape index: {}]   ;;  %s325_s2 = inlined_call_operand.vmem [shape: f32[1,128], index: 2, kind: input, shape index: {}]   ;;  %s326_s3 = inlined_call_operand.vmem [shape: bf16[16,128], index: 3, kind: output, shape index: {}]  }
   0x1 LB: > { %s251_s13 = sadd.s32 4294967295, %s278_s12   ;;  %p255_p0 = scmp.ge.s32.totalorder %s278_s12, 1  ;;  %s278_s12 = sphi %s300_s12, %s13_s12  }
   0x2   : > { %p136_p1 = scmp.lt.s32.totalorder %s278_s12, 3 }
   0x4   : > { %p137_p2 = pnand %p255_p0, %p136_p1 }
   0x5   : > { %p158_p3 = scmp.lt.s32.totalorder (!%p137_p2), %s251_s13, 1  ;;  %v258_v10 = vld [vmem:[%s324_s1] ss:$0 sm:$0xff] (!%p137_p2) }
   0x6   : > { %140 = sbr.rel (%p137_p2) target bundleno = 333 (0x14d), region = 32  ;;  %v259_v12 = vld [vmem:[%s325_s2] ss:$0 sm:$0xff] (!%p137_p2) }
   0xd   : > { %s328_s13 = smov (!%p158_p3, %s251_s13), 1 }
   0xe   : > { %s256_s14 = sshll.u32 %s328_s13, 2 }
   0xf   : > { %s161_s17 = scalar_lea.vmem %s323_s0, %s256_s14  ;;  %s165_s24 = scalar_lea.vmem %s326_s3, %s256_s14 }
  0x10   : > { %v166_v0 = vld [vmem:[%s161_s17] sm:$0xf] }
  0x11   : > { %v167_v1 = vunpack.c.l.bf16 %v166_v0 }
  0x13   : > { %170 = vadd.xlane.f32.xlu0 %v167_v1 }
  0xa0   : > { %v171_v2 = vpop.xlane.xlu0 %170 }
  0xa1   : > { %v173_v3 = vmul.f32 0.0078125, %v171_v2 }
  0xa3   : > { %v174_v4 = vsub.f32 %v167_v1, %v173_v3 }
  0xa5   : > { %v175_v5 = vmul.f32 %v174_v4, %v174_v4 }
  0xa7   : > { %176 = vadd.xlane.f32.xlu0 %v175_v5 }
 0x134   : > { %v177_v6 = vpop.xlane.xlu0 %176 }
 0x135   : > { %v178_v7 = vmul.f32 0.0078125, %v177_v6 }
 0x137   : > { %v179_v8 = vadd.f32 1e-12, %v178_v7 }
 0x139   : > { %270 = vrsqrt.f32 %v179_v8 }
 0x143   : > { %v271_v9 = vpop.eup %270 }
 0x144   : > { %v181_v11 = vmul.f32 %v271_v9, %v174_v4 }
 0x146   : > { %v188_v13 = vmul.f32 %v258_v10, %v181_v11 }
 0x148   : > { %v195_v14 = vadd.f32 %v259_v12, %v188_v13 }
 0x14a   : > { %v196_v15 = vpack.c.bf16 %v195_v14, %v195_v14 }
 0x14c   : > { %197 = vst [vmem:[%s165_s24] sm:$0xf] %v196_v15 }
 0x14d PF: > { %s13_s12 = sadd.s32 1, %s278_s12  }
 0x14e   : > { %p10_p4 = scmp.ge.s32.totalorder %s13_s12, 4  }
 0x150   :  { %12 = sbr.rel (!%p10_p4) target bundleno = 1 (0x1), region = 62 }

// kernel: bert_classifier_forward.5
= control target key start
LH: loop header
LB: loop body
LE: loop exit
PB: predicated region body
PF: predicated region fallthrough
CT: control target
= control target key end

     0   :  { %v384_v1 = vmov 0.0   ;;  %vm385_vm0 = vmmov 0   ;;  %s486_s0 = inlined_call_operand.vmem [shape: bf16[2,128], index: 0, kind: input, shape index: {}]   ;;  %s487_s1 = inlined_call_operand.vmem [shape: bf16[128,128], index: 1, kind: input, shape index: {}]   ;;  %s488_s2 = inlined_call_operand.vmem [shape: f32[1,128], index: 2, kind: input, shape index: {}]   ;;  %s489_s3 = inlined_call_operand.vmem [shape: bf16[128,128], index: 3, kind: input, shape index: {}]   ;;  %s490_s4 = inlined_call_operand.vmem [shape: f32[1,128], index: 4, kind: input, shape index: {}]   ;;  %s491_s5 = inlined_call_operand.hbm [shape: f32[2,128], index: 5, kind: output, shape index: {}]  }
   0x1   :  { %v342_v0 = vld [vmem:[%s487_s1] sm:$0xff]   ;;  %299 = vmatprep.subr.bf16.mxu0 %v384_v1  ;;  %319 = vmatprep.subr.bf16.mxu1 %v384_v1  ;;  %v343_v2 = vld [vmem:[%s487_s1 + $0x8] sm:$0xff]   ;;  %v344_v3 = vld [vmem:[%s487_s1 + $0x10] sm:$0xff]  }
   0x2   :  { %300 = vmatpush3.bf16.msra.mxu0 %v342_v0  ;;  %315 = vmatprep.mubr.msk.bf16.mxu0 %vm385_vm0, %v384_v1  ;;  %v350_v4 = vld [vmem:[%s489_s3] sm:$0xff]   ;;  %v345_v5 = vld [vmem:[%s487_s1 + $0x18] sm:$0xff]   ;;  %v351_v6 = vld [vmem:[%s489_s3 + $0x8] sm:$0xff]  }
   0x3   :  { %301 = vmatprep.subr.bf16.mxu0 %v384_v1  ;;  %335 = vmatprep.mubr.msk.bf16.mxu1 %vm385_vm0, %v384_v1  ;;  %v346_v7 = vld [vmem:[%s487_s1 + $0x20] sm:$0xff]   ;;  %v352_v8 = vld [vmem:[%s489_s3 + $0x10] sm:$0xff]  }
   0x4   :  { %320 = vmatpush3.bf16.msra.mxu1 %v350_v4 }
   0x5   :  { %321 = vmatprep.subr.bf16.mxu1 %v384_v1 }
   0x6   :  { %302 = vmatpush3.bf16.msra.mxu0 %v343_v2 }
   0x7   :  { %303 = vmatprep.subr.bf16.mxu0 %v384_v1 }
   0x8   :  { %322 = vmatpush3.bf16.msra.mxu1 %v351_v6 }
   0xa   :  { %304 = vmatpush3.bf16.msra.mxu0 %v344_v3 }
   0xb   :  { %305 = vmatprep.subr.bf16.mxu0 %v384_v1 }
   0xe   :  { %306 = vmatpush3.bf16.msra.mxu0 %v345_v5 }
   0xf   :  { %307 = vmatprep.subr.bf16.mxu0 %v384_v1 }
  0x10   :  { %10 = vsyncpa [#allocation3], 0  ;;  %323 = vmatprep.subr.bf16.mxu1 %v384_v1  ;;  %v347_v9 = vld [vmem:[%s487_s1 + $0x28] sm:$0xff]   ;;  %v353_v10 = vld [vmem:[%s489_s3 + $0x18] sm:$0xff]  }
  0x11   :  { %324 = vmatpush3.bf16.msra.mxu1 %v352_v8  ;;  %v348_v11 = vld [vmem:[%s487_s1 + $0x30] sm:$0xff]   ;;  %v349_v12 = vld [vmem:[%s487_s1 + $0x38] sm:$0xff]   ;;  %v22_v13 = vld [vmem:[%s486_s0] sm:$0x1] }
  0x12   :  { %308 = vmatpush3.bf16.msra.mxu0 %v346_v7  ;;  %325 = vmatprep.subr.bf16.mxu1 %v384_v1  ;;  %v354_v14 = vld [vmem:[%s489_s3 + $0x20] sm:$0xff]   ;;  %v355_v15 = vld [vmem:[%s489_s3 + $0x28] sm:$0xff]   ;;  %v356_v16 = vld [vmem:[%s489_s3 + $0x30] sm:$0xff]  }
  0x13   :  { %309 = vmatprep.subr.bf16.mxu0 %v384_v1  ;;  %v357_v17 = vld [vmem:[%s489_s3 + $0x38] sm:$0xff]   ;;  %v263_v18 = vld [vmem:[%s488_s2] ss:$0 sm:$0xff]  ;;  %s386_s3 = smov [#allocation2]  }
  0x14   :  { %v272_v26 = vld [vmem:[%s490_s4] ss:$0 sm:$0xff]  ;;  %s255_s29 = sshll.u32 %s386_s3, 4  ;;  %s256_s29 = int_to_ptr.vmem [resolvable:$true] %s255_s29 }
  0x15   :  { %326 = vmatpush3.bf16.msra.mxu1 %v353_v10  ;;  %s360_s2 = scalar_lea.vmem %s256_s29, 32  ;;  %p365_p1 = scmp.lt.s32.totalorder %s256_s29, %s256_s29 }
  0x16   :  { %310 = vmatpush3.bf16.msra.mxu0 %v347_v9  ;;  %327 = vmatprep.subr.bf16.mxu1 %v384_v1  ;;  %p361_p0 = scmp.ne.s32.totalorder %s256_s29, %s360_s2  ;;  %p366_p2 = scmp.lt.s32.totalorder %s360_s2, %s360_s2 }
  0x17   :  { %311 = vmatprep.subr.bf16.mxu0 %v384_v1 }
  0x18   :  { %p367_p3 = por %p366_p2, %p365_p1 }
  0x19   :  { %328 = vmatpush3.bf16.msra.mxu1 %v354_v14 }
  0x1a   :  { %312 = vmatpush3.bf16.msra.mxu0 %v348_v11  ;;  %329 = vmatprep.subr.bf16.mxu1 %v384_v1  ;;  %p368_p4 = pnand %p367_p3, %p361_p0 }
  0x1b   :  { %313 = vmatprep.subr.bf16.mxu0 %v384_v1 }
  0x1d   :  { %330 = vmatpush3.bf16.msra.mxu1 %v355_v15 }
  0x1e   :  { %314 = vmatpush3.bf16.msra.mxu0 %v349_v12  ;;  %331 = vmatprep.subr.bf16.mxu1 %v384_v1 }
  0x21   :  { %316 = vmatmul.mubr.bf16.vlgmr.msra.gmra.mrb[0].mxu0 %v22_v13  ;;  %332 = vmatpush3.bf16.msra.mxu1 %v356_v16 }
  0x22   :  { %333 = vmatprep.subr.bf16.mxu1 %v384_v1 }
  0x25   :  { %334 = vmatpush3.bf16.msra.mxu1 %v357_v17 }
  0xf4   :  { %v128_v19 = vpop.f32.mrb[0].mxu0 }
  0xf5   :  { %v129_v20 = vadd.f32 %v263_v18, %v128_v19  ;;  %v317_v21 = vpop.f32.mrb[1].mxu0 }
  0xf6   :  { %v131_v22 = vpop.f32.mrb[2].mxu0 }
  0xf7   :  { %358 = vtanh.f32 %v129_v20  ;;  %v318_v23 = vpop.f32.mrb[3].mxu0 }
 0x101   :  { %v359_v24 = vpop.eup %358 }
 0x102   :  { %v135_v25 = vpack.c.bf16 %v359_v24, %v359_v24 }
 0x104   :  { %336 = vmatmul.mubr.bf16.vlgmr.msra.gmra.mrb[0].mxu1 %v135_v25 }
 0x1d7   :  { %v241_v27 = vpop.f32.mrb[0].mxu1 }
 0x1d8   :  { %v242_v28 = vadd.f32 %v272_v26, %v241_v27  ;;  %v337_v29 = vpop.f32.mrb[1].mxu1 }
 0x1d9   :  { %v244_v30 = vpop.f32.mrb[2].mxu1 }
 0x1da   :  { %v247_v31 = vmax.f32 %v242_v28, 0.0  ;;  %v338_v32 = vpop.f32.mrb[3].mxu1 }
 0x1dc   :  { %248 = vst [vmem:[#allocation2] sm:$0x3] %v247_v31 }
 0x1dd   :  { %371 = shalt.err (!%p368_p4)
}
 0x1de   :  { %s372_s4 = scalar_lea.hbm %s491_s5, 32 }
 0x1df   :  { %p373_p5 = scmp.ne.s32.totalorder %s491_s5, %s372_s4  ;;  %p376_p6 = scmp.lt.u32.totalorder %s372_s4, %s491_s5 }
 0x1e1   :  { %p378_p7 = pnand %p376_p6, %p373_p5 }
 0x1e3   :  { %381 = shalt.err (!%p378_p7)
}
 0x1e4   :  { %258 = dma.vmem_to_hbm [thread:$0]  %s256_s29, 32, %s491_s5, [#allocation3]  }
 0x1e5   :  { %382 = dma.done.wait [#allocation3], 32  }
 0x1e6   :  { %383 = vsyncadd [#allocation3], 4294967264 }
 0x1e7   :  { %262 = vsyncpa [#allocation3], 1 }

// kernel: bert_classifier_forward.4
= control target key start
LH: loop header
LB: loop body
LE: loop exit
PB: predicated region body
PF: predicated region fallthrough
CT: control target
= control target key end

     0   :  { %s3139_s0 = inlined_call_operand.vmem [shape: f32[2,1,8], index: 0, kind: input, shape index: {}]   ;;  %s3140_s1 = inlined_call_operand.vmem [shape: bf16[2,8,128], index: 1, kind: input, shape index: {}]   ;;  %s3141_s2 = inlined_call_operand.hbm [shape: bf16[2,128,384], index: 2, kind: input, shape index: {}]   ;;  %s3142_s3 = inlined_call_operand.vmem [shape: f32[2,1,384], index: 3, kind: input, shape index: {}]   ;;  %s3143_s4 = inlined_call_operand.hbm [shape: bf16[2,128,128], index: 4, kind: input, shape index: {}]   ;;  %s3144_s5 = inlined_call_operand.vmem [shape: f32[2,1,128], index: 5, kind: input, shape index: {}]   ;;  %s3145_s6 = inlined_call_operand.vmem [shape: f32[2,1,128], index: 6, kind: input, shape index: {}]   ;;  %s3146_s7 = inlined_call_operand.vmem [shape: f32[2,1,128], index: 7, kind: input, shape index: {}]   ;;  %s3147_s8 = inlined_call_operand.vmem [shape: bf16[2,128,256], index: 8, kind: input, shape index: {}]   ;;  %s3148_s9 = inlined_call_operand.vmem [shape: f32[2,1,256], index: 9, kind: input, shape index: {}]   ;;  %s3149_s10 = inlined_call_operand.hbm [shape: bf16[2,256,128], index: 10, kind: input, shape index: {}]   ;;  %s3150_s11 = inlined_call_operand.vmem [shape: f32[2,1,128], index: 11, kind: input, shape index: {}]   ;;  %s3151_s12 = inlined_call_operand.vmem [shape: f32[2,1,128], index: 12, kind: input, shape index: {}]   ;;  %s3152_s13 = inlined_call_operand.vmem [shape: f32[2,1,128], index: 13, kind: input, shape index: {}]   ;;  %s3153_s14 = inlined_call_operand.vmem [shape: bf16[2,8,128], index: 14, kind: output, shape index: {}]  }
   0x1   :  { %3165 = sst [smem:[#allocation20_spill]] %s3140_s1 }
   0x2   :  { %3166 = sst [smem:[#allocation21_spill]] %s3141_s2 }
   0x3   :  { %3167 = sst [smem:[#allocation22_spill]] %s3142_s3 }
   0x4   :  { %3168 = sst [smem:[#allocation23_spill]] %s3143_s4 }
   0x5   :  { %3169 = sst [smem:[#allocation24_spill]] %s3144_s5 }
   0x6   :  { %3170 = sst [smem:[#allocation25_spill]] %s3145_s6 }
   0x7   :  { %3171 = sst [smem:[#allocation26_spill]] %s3146_s7 }
   0x8   :  { %3172 = sst [smem:[#allocation27_spill]] %s3147_s8 }
   0x9   :  { %3173 = sst [smem:[#allocation28_spill]] %s3148_s9 }
   0xa   :  { %3174 = sst [smem:[#allocation29_spill]] %s3149_s10 }
   0xb   :  { %3175 = sst [smem:[#allocation30_spill]] %s3150_s11 }
   0xc   :  { %3176 = sst [smem:[#allocation31_spill]] %s3151_s12 }
   0xd   :  { %3177 = sst [smem:[#allocation32_spill]] %s3152_s13 }
   0xe   :  { %3178 = sst [smem:[#allocation33_spill]] %s3153_s14 }
   0xf   :  { %19 = vsyncpa [#allocation5], 0 }
  0x10   :  { %21 = vsyncpa [#allocation5 + $0x1], 0 }
  0x11   :  { %22 = vsyncpa [#allocation7], 0 }
  0x12   :  { %24 = vsyncpa [#allocation7 + $0x1], 0  ;;  %s2660_s29 = smov 0   ;;  %s2662_s30 = smov 0  }
  0x13   :  { %s2664_s15 = smov 0   ;;  %s2666_s16 = smov 0  }
  0x14   :  { %s2668_s17 = smov 0   ;;  %s2670_s18 = smov 0  }
  0x15   :  { %s2672_s19 = smov 0   ;;  %s2674_s20 = smov 0  }
  0x16 LB: > { %3179 = sst [smem:[#allocation11_spill]] %s2548_s30  ;;  %s3156_s21 = sadd.s32 4294967295, %s2572_s20   ;;  %s2572_s20 = sphi %s2674_s20, %s30_s20   ;;  %s2568_s19 = sphi %s2672_s19, %s3230_s19   ;;  %s2564_s18 = sphi %s2670_s18, %s3229_s18   ;;  %s2560_s17 = sphi %s2668_s17, %s3228_s17   ;;  %s2556_s16 = sphi %s2666_s16, %s3227_s16   ;;  %s2552_s15 = sphi %s2664_s15, %s3226_s15   ;;  %s2548_s30 = sphi %s2662_s30, %s3225_s30   ;;  %s2544_s29 = sphi %s2660_s29, %s3224_s29  }
  0x17   : > { %3180 = sst [smem:[#allocation12_spill]] %s2552_s15  ;;  %s39_s22 = sadd.s32 1, %s2564_s18 }
  0x18   : > { %3181 = sst [smem:[#allocation13_spill]] %s2564_s18  ;;  %p40_p0 = scmp.ge.s32.totalorder %s39_s22, 2 }
  0x19   : > { %3182 = sst [smem:[#allocation14_spill]] %s2568_s19  ;;  %s42_s23 = sadd.s32 1, %s2568_s19 }
  0x1a   : > { %3183 = sst [smem:[#allocation15_spill]] %s2572_s20  ;;  %s101_s24 = sadd.s32 1, %s2552_s15 }
  0x1b   : > { %p108_p1 = scmp.ne.s32.totalorder %s2552_s15, %s2548_s30  ;;  %s3232_s22 = smov (%p40_p0, %s39_s22), 0 }
  0x1c   : > { %3184 = sst [smem:[#allocation16_spill]] %s3232_s22  ;;  %s3234_s23 = smov (!%p40_p0, %s42_s23), %s2568_s19 }
  0x1d   : > { %s98_s25 = ssub.s32 %s2564_s18, %s3232_s22  ;;  %p109_p2 = scmp.eq.s32.totalorder %s2572_s20, 0 }
  0x1e   : > { %p44_p3 = scmp.ge.s32.totalorder %s3234_s23, 2  ;;  %p99_p4 = scmp.eq.s32.totalorder %s98_s25, 0 }
  0x1f   : > { %p110_p5 = por %p109_p2, %p108_p1  ;;  %p114_p6 = scmp.ne.s32.totalorder %s2548_s30, %s2544_s29 }
  0x20   : > { %s3236_s23 = smov (%p44_p3, %s3234_s23), 0  ;;  %p115_p7 = scmp.eq.s32.totalorder %s3156_s21, 0 }
  0x21   : > { %3185 = sst [smem:[#allocation17_spill]] %s3236_s23  ;;  %p2243_p8 = scmp.lt.s32.totalorder %s2572_s20, 4 }
  0x22   : > { %s2714_s26 = scalar_select %p99_p4, %s2552_s15, %s101_s24  }
  0x23   : > { %s2720_s27 = sand.u32 1, %s2552_s15   ;;  %p2722_p9 = por %p115_p7, %p114_p6 }
  0x24   : > { %3186 = sst [smem:[#allocation18_spill]] %s2714_s26  ;;  %s491_s22 = sand.u32 1, %s2572_s20  }
  0x25   : > { %s3187_s28 = scalar_select %p2722_p9, 1, 0 }
  0x26   : > { %p2727_p10 = pnand %p2243_p8, %p110_p5  ;;  %s2013_s29 = sshll.u32 %s2720_s27, 6 }
  0x27   : > { %s2107_s23 = sshll.u32 %s2564_s18, 10  ;;  %s3189_s4 = sld [smem:[#allocation23_spill]] }
  0x28   : > { %s495_s26 = scalar_lea.vmem [#allocation6], %s2013_s29  ;;  %s2741_s14 = scalar_lea.sflag [#allocation7], %s491_s22 }
  0x29   : > { %s502_s15 = sshll.u32 %s495_s26, 4  ;;  %p2747_p13 = pneg %p2727_p10  ;;  %s2738_s15 = int_to_ptr.vmem [resolvable:$true] %s502_s15 }
  0x2d   : > { %s2736_s21 = scalar_lea.hbm %s3189_s4, %s2107_s23  ;;  %s2417_s26 = scalar_lea.hbm %s3189_s4, 2048 }
  0x2e   : > { %s2412_s13 = scalar_lea.hbm %s2736_s21, 1024  ;;  %p2418_p2 = scmp.lt.u32.totalorder %s2736_s21, %s3189_s4 }
  0x2f   : > { %p2413_p12 = scmp.ne.s32.totalorder %s2736_s21, %s2412_s13  ;;  %p2419_p3 = scmp.lt.u32.totalorder %s2417_s26, %s2412_s13 }
  0x30   : > { %p2421_p5 = scmp.lt.u32.totalorder %s2412_s13, %s2736_s21 }
  0x31   : > { %p2415_p0 = pnand %p2747_p13, %p2413_p12  ;;  %p2420_p4 = por %p2419_p3, %p2418_p2 }
  0x33   : > { %p2416_p1 = pneg %p2415_p0  ;;  %p2422_p6 = por %p2421_p5, %p2420_p4 }
  0x35   : > { %p2423_p7 = pnand %p2422_p6, %p2416_p1 }
  0x37   : > { %2426 = shalt.err (!%p2423_p7)
}
  0x38   : > { %s2427_s22 = scalar_lea.vmem %s2738_s15, 1024  ;;  %s2574_s19 = smov [#allocation6]  }
  0x39   : > { %p2428_p8 = scmp.ne.s32.totalorder %s2738_s15, %s2427_s22  ;;  %s2432_s23 = sshll.u32 %s2574_s19, 4  ;;  %s2433_s23 = int_to_ptr.vmem [resolvable:$false] %s2432_s23 }
  0x3a   : > { %s2434_s29 = scalar_lea.vmem %s2433_s23, 2048  ;;  %p2435_p11 = scmp.lt.s32.totalorder %s2738_s15, %s2433_s23 }
  0x3b   : > { %p2430_p12 = pnand %p2428_p8, %p2747_p13  ;;  %p2436_p9 = scmp.lt.s32.totalorder %s2434_s29, %s2427_s22 }
  0x3d   : > { %p2431_p0 = pneg %p2430_p12  ;;  %p2437_p2 = por %p2436_p9, %p2435_p11 }
  0x3f   : > { %p2438_p3 = pnand %p2437_p2, %p2431_p0 }
  0x41   : > { %2441 = shalt.err (!%p2438_p3)
}
  0x42   : > { %s3159_s13 = smov 64   ;;  %s3160_s26 = smov 4  }
  0x43   : > { %2239 = dma.hbm_to_vmem [thread:$0]  (!%p2727_p10), %s2736_s21, 1024, %s2738_s15, %s2741_s14, %s3159_s13, %s3159_s13, %s3160_s26  }
  0x44   : > { %p582_p9 = scmp.lt.s32.totalorder %s2572_s20, 5  ;;  %p3191_p11 = scmp.ge.s32.totalorder %s2572_s20, 1 }
  0x45   : > { %s2223_s22 = smul.u32 192, %s2720_s27  ;;  %s3193_s2 = sld [smem:[#allocation21_spill]] }
  0x46   : > { %p2777_p1 = pnand %p3191_p11, %p582_p9  ;;  %s2224_s19 = smul.u32 3072, %s2564_s18 }
  0x47   : > { %s467_s11 = scalar_lea.vmem [#allocation4], %s2223_s22  ;;  %s2016_s15 = sshll.u32 %s2720_s27, 7 }
  0x48   : > { %s3192_s24 = scalar_select %p2777_p1, 1, 0 }
  0x49   : > { %s474_s9 = sshll.u32 %s467_s11, 4  ;;  %s464_s21 = scalar_lea.sflag [#allocation5], %s2720_s27  ;;  %s2788_s9 = int_to_ptr.vmem [resolvable:$true] %s474_s9 }
  0x4b   : > { %s2786_s4 = scalar_lea.hbm %s3193_s2, %s2224_s19  ;;  %s2447_s19 = scalar_lea.hbm %s3193_s2, 6144 }
  0x4c   : > { %s2442_s13 = scalar_lea.hbm %s2786_s4, 3072  ;;  %p2448_p7 = scmp.lt.u32.totalorder %s2786_s4, %s3193_s2 }
  0x4d   : > { %p2443_p4 = scmp.ne.s32.totalorder %s2786_s4, %s2442_s13  ;;  %p2449_p8 = scmp.lt.u32.totalorder %s2447_s19, %s2442_s13 }
  0x4e   : > { %p2451_p0 = scmp.lt.u32.totalorder %s2442_s13, %s2786_s4 }
  0x4f   : > { %p2445_p5 = pnand %p2443_p4, %p2747_p13  ;;  %p2450_p12 = por %p2449_p8, %p2448_p7 }
  0x51   : > { %p2446_p6 = pneg %p2445_p5  ;;  %p2452_p2 = por %p2451_p0, %p2450_p12 }
  0x53   : > { %p2453_p3 = pnand %p2452_p2, %p2446_p6 }
  0x55   : > { %2456 = shalt.err (!%p2453_p3)
}
  0x56   : > { %s2457_s11 = scalar_lea.vmem %s2788_s9, 3072  ;;  %s2577_s8 = smov [#allocation4]  }
  0x57   : > { %p2458_p9 = scmp.ne.s32.totalorder %s2788_s9, %s2457_s11  ;;  %s2462_s26 = sshll.u32 %s2577_s8, 4  ;;  %s2463_s26 = int_to_ptr.vmem [resolvable:$false] %s2462_s26 }
  0x58   : > { %s2464_s22 = scalar_lea.vmem %s2463_s26, 6144  ;;  %p2465_p5 = scmp.lt.s32.totalorder %s2788_s9, %s2463_s26 }
  0x59   : > { %p2460_p11 = pnand %p2458_p9, %p2747_p13  ;;  %p2466_p1 = scmp.lt.s32.totalorder %s2464_s22, %s2457_s11 }
  0x5b   : > { %p2461_p4 = pneg %p2460_p11  ;;  %p2467_p7 = por %p2466_p1, %p2465_p5 }
  0x5d   : > { %p2468_p8 = pnand %p2467_p7, %p2461_p4 }
  0x5f   : > { %2471 = shalt.err (!%p2468_p8)
}
  0x60   : > { %s2578_s13 = smov 192   ;;  %s2579_s19 = smov 12  }
  0x61   : > { %2236 = dma.hbm_to_vmem [thread:$0]  (!%p2727_p10), %s2786_s4, 3072, %s2788_s9, %s464_s21, %s2578_s13, %s2578_s13, %s2579_s19  }
  0x62   : > { %s2108_s23 = sshll.u32 %s2564_s18, 11  ;;  %s3194_s10 = sld [smem:[#allocation29_spill]] }
  0x63   : > { %s549_s26 = scalar_lea.vmem [#allocation8], %s2016_s15 }
  0x64   : > { %s556_s22 = sshll.u32 %s549_s26, 4  ;;  %s2823_s22 = int_to_ptr.vmem [resolvable:$true] %s556_s22 }
  0x68   : > { %s2819_s11 = scalar_lea.hbm %s3194_s10, %s2108_s23  ;;  %s2477_s21 = scalar_lea.hbm %s3194_s10, 4096 }
  0x69   : > { %s2472_s2 = scalar_lea.hbm %s2819_s11, 2048  ;;  %p2478_p0 = scmp.lt.u32.totalorder %s2819_s11, %s3194_s10 }
  0x6a   : > { %p2473_p1 = scmp.ne.s32.totalorder %s2819_s11, %s2472_s2  ;;  %p2479_p2 = scmp.lt.u32.totalorder %s2477_s21, %s2472_s2 }
  0x6b   : > { %p2481_p9 = scmp.lt.u32.totalorder %s2472_s2, %s2819_s11 }
  0x6c   : > { %p2475_p6 = pnand %p2473_p1, %p2747_p13  ;;  %p2480_p3 = por %p2479_p2, %p2478_p0 }
  0x6e   : > { %p2476_p12 = pneg %p2475_p6  ;;  %p2482_p11 = por %p2481_p9, %p2480_p3 }
  0x70   : > { %p2483_p4 = pnand %p2482_p11, %p2476_p12 }
  0x72   : > { %2486 = shalt.err (!%p2483_p4)
}
  0x73   : > { %s2487_s27 = scalar_lea.vmem %s2823_s22, 2048  ;;  %s2580_s15 = smov [#allocation8]  }
  0x74   : > { %p2488_p5 = scmp.ne.s32.totalorder %s2823_s22, %s2487_s27  ;;  %s2492_s23 = sshll.u32 %s2580_s15, 4  ;;  %s2493_s23 = int_to_ptr.vmem [resolvable:$false] %s2492_s23 }
  0x75   : > { %s2494_s29 = scalar_lea.vmem %s2493_s23, 4096  ;;  %p2495_p1 = scmp.lt.s32.totalorder %s2823_s22, %s2493_s23 }
  0x76   : > { %p2490_p7 = pnand %p2488_p5, %p2747_p13  ;;  %p2496_p6 = scmp.lt.s32.totalorder %s2494_s29, %s2487_s27 }
  0x78   : > { %p2491_p8 = pneg %p2490_p7  ;;  %p2497_p0 = por %p2496_p6, %p2495_p1 }
  0x7a   : > { %p2498_p2 = pnand %p2497_p0, %p2491_p8 }
  0x7c   : > { %2501 = shalt.err (!%p2498_p2)
}
  0x7d   : > { %s3195_s2 = smov 4   ;;  %s3196_s8 = smov 64  }
  0x7e   : > { %2242 = dma.hbm_to_vmem [thread:$0]  (!%p2727_p10), %s2819_s11, 2048, %s2823_s22, %s2741_s14, %s3196_s8, %s3196_s8, %s3195_s2  }
  0x7f   : > { %p3197_p13 = scmp.ne.s32.totalorder %s3192_s24, 0 }
  0x81   : > { %586 = sbr.rel (%p3197_p13) target bundleno = 3140 (0xc44), region = 76 }
  0x88   : > { %s2853_s12 = sand.u32 1, %s2548_s30   ;;  %p3198_p12 = scmp.ne.s32.totalorder %s3187_s28, 0 }
  0x89   : > { %s2225_s26 = smul.u32 192, %s2853_s12  ;;  %s589_s4 = scalar_lea.sflag [#allocation5], %s2853_s12 }
  0x8b   : > { %s2857_s9 = scalar_lea.vmem [#allocation4], %s2225_s26 }
  0x8c   : > { %2535 = dma.done.wait (%p3198_p12), %s589_s4, 3072  }
  0x8d   : > { %2537 = vsyncadd (%p3198_p12), %s589_s4, 4294964224  ;;  %s3199_s14 = sadd.s32 4294967295, %s2572_s20   ;;  %s2020_s24 = sshll.u32 %s2853_s12, 6 }
  0x8e   : > { %s597_s25 = sand.u32 1, %s3199_s14   ;;  %s2866_s22 = scalar_lea.vmem [#allocation6], %s2020_s24 }
  0x8f   : > { %s598_s11 = scalar_lea.sflag [#allocation7], %s597_s25  ;;  %3200 = sst [smem:[#allocation19_spill]] %s2866_s22 }
  0x90   : > { %2539 = dma.done.wait (%p3198_p12), %s598_s11, 3072  }
  0x91   : > { %2541 = vsyncadd (%p3198_p12), %s598_s11, 4294964224  ;;  %s2021_s21 = sshll.u32 %s2853_s12, 7  ;;  %p702_p10 = scmp.lt.s32.totalorder %s2560_s17, 1 }
  0x92   : > { %p709_p3 = scmp.lt.s32.totalorder %s2556_s16, 1  ;;  %s3201_s1 = sld [smem:[#allocation20_spill]] }
  0x93   : > { %s3238_s17 = smov (!%p702_p10, %s2560_s17), 1  ;;  %s3204_s3 = sld [smem:[#allocation22_spill]] }
  0x94   : > { %s2879_s13 = scalar_select %p709_p3, %s2556_s16, 1 }
  0x95   : > { %s2022_s15 = sshll.u32 %s3238_s17, 2  ;;  %s3206_s20 = sld [smem:[#allocation27_spill]] }
  0x96   : > { %s2226_s8 = smul.u32 3, %s2879_s13  ;;  %s2109_s23 = sshll.u32 %s2879_s13, 7 }
  0x97   : > { %s2025_s29 = sshll.u32 %s2879_s13, 1  ;;  %s3207_s14 = sld [smem:[#allocation28_spill]] }
  0x98   : > { %s708_s2 = scalar_lea.vmem %s3201_s1, %s2022_s15  ;;  %s3209_s10 = sld [smem:[#allocation31_spill]] }
  0x99   : > { %s2901_s27 = scalar_lea.vmem %s3204_s3, %s2226_s8  ;;  %s3208_s8 = sld [smem:[#allocation30_spill]] }
  0x9a   : > { %s3210_s5 = sld [smem:[#allocation32_spill]]  ;;  %s2936_s4 = scalar_lea.vmem [#allocation8], %s2021_s21 }
  0x9b   : > { %s2912_s12 = scalar_lea.vmem %s3206_s20, %s2109_s23  ;;  %s3211_s20 = sld [smem:[#allocation33_spill]] }
  0x9c   : > { %p2027_p9 = scmp.ne.s32.totalorder %s2556_s16, 0 }
  0x9d   : > { %s2917_s25 = scalar_lea.vmem %s3207_s14, %s2025_s29  ;;  %v749_v0 = vld [vmem:[%s708_s2] sm:$0xf] (!%p2027_p9) }
  0x9e   : > { %s736_s28 = scalar_lea.vmem %s3209_s10, %s2879_s13  ;;  %748 = sbr.rel (%p2027_p9) target bundleno = 165 (0xa5), region = 92  ;;  %750 = vst [vmem:[#allocation2] sm:$0xf] (!%p2027_p9), %v749_v0 }
  0x9f   : > { %s733_s19 = scalar_lea.vmem %s3208_s8, %s2879_s13 }
  0xa0   : > { %s739_s22 = scalar_lea.vmem %s3210_s5, %s2879_s13 }
  0xa1   : > { %s2934_s23 = scalar_lea.vmem %s3211_s20, %s2022_s15 }
  0xa5 PF: > { %v2316_v1 = vld [vmem:[%s2857_s9 + $0x4] ss:$12 sps:$4 sm:$0xff]   ;;  %v2318_v2 = vld [vmem:[%s2857_s9] ss:$12 sps:$4 sm:$0xff]   ;;  %v2581_v3 = vmov 0   ;;  %v2582_v4 = vmov 0.0   ;;  %v787_v28 = vlaneseq  ;;  %s3212_s7 = scalar_lea.vmem %s3139_s0, %s3238_s17 }
  0xa6   : > { %962 = vmatprep.mubr.bf16.mxu0 %v2581_v3  ;;  %2159 = vmatprep.subr.bf16.mxu1 %v2582_v4  ;;  %v2319_v5 = vld [vmem:[%s2857_s9 + $0x1c] ss:$12 sps:$4 sm:$0xff]   ;;  %v2321_v6 = vld [vmem:[%s2857_s9 + $0x18] ss:$12 sps:$4 sm:$0xff]   ;;  %v2322_v7 = vld [vmem:[%s2857_s9 + $0x34] ss:$12 sps:$4 sm:$0xff]  }
  0xa7   : > { %930 = vmatprep.subr.bf16.mxu0 %v2316_v1  ;;  %v2324_v8 = vld [vmem:[%s2857_s9 + $0x30] ss:$12 sps:$4 sm:$0xff]   ;;  %v2325_v9 = vld [vmem:[%s2857_s9 + $0x4c] ss:$12 sps:$4 sm:$0xff]   ;;  %v2327_v10 = vld [vmem:[%s2857_s9 + $0x48] ss:$12 sps:$4 sm:$0xff]  }
  0xa8   : > { %931 = vmatpush1.bf16.msra.mxu0 %v2318_v2  ;;  %v2340_v11 = vld [vmem:[%s2857_s9 + $0x8] ss:$12 sps:$4 sm:$0xff]   ;;  %v2328_v12 = vld [vmem:[%s2857_s9 + $0x64] ss:$12 sps:$4 sm:$0xff]   ;;  %v2341_v13 = vld [vmem:[%s2857_s9 + $0x20] ss:$12 sps:$4 sm:$0xff]  }
  0xa9   : > { %932 = vmatprep.subr.bf16.mxu0 %v2319_v5  ;;  %2160 = vmatpush3.bf16.msra.mxu1 %v2340_v11  ;;  %v2330_v14 = vld [vmem:[%s2857_s9 + $0x60] ss:$12 sps:$4 sm:$0xff]   ;;  %v2331_v15 = vld [vmem:[%s2857_s9 + $0x7c] ss:$12 sps:$4 sm:$0xff]   ;;  %v2333_v16 = vld [vmem:[%s2857_s9 + $0x78] ss:$12 sps:$4 sm:$0xff]  }
  0xaa   : > { %2161 = vmatprep.subr.bf16.mxu1 %v2582_v4  ;;  %v2342_v17 = vld [vmem:[%s2857_s9 + $0x38] ss:$12 sps:$4 sm:$0xff]   ;;  %v2334_v18 = vld [vmem:[%s2857_s9 + $0x94] ss:$12 sps:$4 sm:$0xff]   ;;  %v2343_v19 = vld [vmem:[%s2857_s9 + $0x50] ss:$12 sps:$4 sm:$0xff]  }
  0xab   : > { %v2336_v20 = vld [vmem:[%s2857_s9 + $0x90] ss:$12 sps:$4 sm:$0xff]   ;;  %v2337_v21 = vld [vmem:[%s2857_s9 + $0xac] ss:$12 sps:$4 sm:$0xff]   ;;  %v2344_v22 = vld [vmem:[%s2857_s9 + $0x68] ss:$12 sps:$4 sm:$0xff]  }
  0xac   : > { %933 = vmatpush1.bf16.msra.mxu0 %v2321_v6  ;;  %v2339_v23 = vld [vmem:[%s2857_s9 + $0xa8] ss:$12 sps:$4 sm:$0xff]   ;;  %v2345_v24 = vld [vmem:[%s2857_s9 + $0x80] ss:$12 sps:$4 sm:$0xff]   ;;  %v2967_v25 = vld [vmem:[#allocation2] sm:$0xf] }
  0xad   : > { %934 = vmatprep.subr.bf16.mxu0 %v2322_v7  ;;  %2162 = vmatpush3.bf16.msra.mxu1 %v2341_v13  ;;  %v2346_v26 = vld [vmem:[%s2857_s9 + $0x98] ss:$12 sps:$4 sm:$0xff]   ;;  %v2347_v27 = vld [vmem:[%s2857_s9 + $0xb0] ss:$12 sps:$4 sm:$0xff]   ;;  %vm2583_vm0 = vmmov 0   ;;  %v2984_v29 = vshrl.u32 %v787_v28, 7 }
  0xae   : > { %2163 = vmatprep.subr.bf16.mxu1 %v2582_v4  ;;  %2175 = vmatprep.mubr.msk.bf16.mxu1 %vm2583_vm0, %v2582_v4  ;;  %v785_v31 = vld [vmem:[%s2901_s27] sm:$0x7]  ;;  %vm1014_vm1 = vcmask 523264   ;;  %s2584_s3 = smov 64   ;;  %vm1085_vm2 = vcmask 1043456   ;;  %vm1069_vm3 = vcmask 64512  }
  0xaf   : > { %v793_v30 = vsub.s32 1, %v2984_v29  ;;  %v789_v32 = vsub.s32 0, %v2984_v29  ;;  %v797_v44 = vsub.s32 2, %v2984_v29  ;;  %v2053_v54 = vld [vmem:[%s3212_s7] ss:$0 sm:$0xff]  ;;  %vm1130_vm4 = vcmask 519168  }
  0xb0   : > { %935 = vmatpush1.bf16.msra.mxu0 %v2324_v8  ;;  %s3213_s17 = sld [smem:[#allocation19_spill]]  ;;  %vm1254_vm5 = vcmask 1043968   ;;  %s3214_s21 = sld [smem:[#allocation24_spill]] }
  0xb1   : > { %936 = vmatprep.subr.bf16.mxu0 %v2325_v9  ;;  %2164 = vmatpush3.bf16.msra.mxu1 %v2342_v17  ;;  %v794_v33 = vrot.slane %v785_v31, %v793_v30  ;;  %v790_v34 = vrot.slane %v785_v31, %v789_v32  ;;  %v798_v45 = vrot.slane %v785_v31, %v797_v44  ;;  %s3216_s27 = sld [smem:[#allocation25_spill]]  ;;  %s3218_s14 = sld [smem:[#allocation26_spill]] }
  0xb2   : > { %2165 = vmatprep.subr.bf16.mxu1 %v2582_v4  ;;  %p2104_p11 = scmp.ne.s32.totalorder %s2556_s16, 1 }
  0xb4   : > { %937 = vmatpush1.bf16.msra.mxu0 %v2327_v10 }
  0xb5   : > { %938 = vmatprep.subr.bf16.mxu0 %v2328_v12  ;;  %2166 = vmatpush3.bf16.msra.mxu1 %v2343_v19 }
  0xb6   : > { %2167 = vmatprep.subr.bf16.mxu1 %v2582_v4  ;;  %v2355_v44 = vld [vmem:[%s3213_s17 + $0x38] sm:$0xff]   ;;  %s3215_s15 = scalar_lea.vmem %s3214_s21, %s2879_s13 }
  0xb7   : > { %s3217_s29 = scalar_lea.vmem %s3216_s27, %s2879_s13  ;;  %s3219_s11 = scalar_lea.vmem %s3218_s14, %s2879_s13 }
  0xb8   : > { %939 = vmatpush1.bf16.msra.mxu0 %v2330_v14 }
  0xb9   : > { %940 = vmatprep.subr.bf16.mxu0 %v2331_v15  ;;  %2168 = vmatpush3.bf16.msra.mxu1 %v2344_v22 }
  0xba   : > { %2169 = vmatprep.subr.bf16.mxu1 %v2582_v4 }
  0xbc   : > { %941 = vmatpush1.bf16.msra.mxu0 %v2333_v16 }
  0xbd   : > { %942 = vmatprep.subr.bf16.mxu0 %v2334_v18  ;;  %2170 = vmatpush3.bf16.msra.mxu1 %v2345_v24 }
  0xbe   : > { %2171 = vmatprep.subr.bf16.mxu1 %v2582_v4 }
  0xc0   : > { %943 = vmatpush1.bf16.msra.mxu0 %v2336_v20 }
  0xc1   : > { %944 = vmatprep.subr.bf16.mxu0 %v2337_v21  ;;  %2172 = vmatpush3.bf16.msra.mxu1 %v2346_v26 }
  0xc2   : > { %2173 = vmatprep.subr.bf16.mxu1 %v2582_v4 }
  0xc4   : > { %945 = vmatpush1.bf16.msra.mxu0 %v2339_v23 }
  0xc5   : > { %2203 = vmatprep.subr.bf16.mxu0 %v2582_v4  ;;  %2174 = vmatpush3.bf16.msra.mxu1 %v2347_v27 }
  0xc6   : > { %2179 = vmatprep.subr.bf16.mxu1 %v2582_v4 }
  0xc7   : > { %963 = vmatmul.mubr.bf16.vlgmr.msra.gmra.mrb[0].mxu0 %v2967_v25 }
  0xc8   : > { %2219 = vmatprep.mubr.msk.bf16.mxu0 %vm2583_vm0, %v2582_v4  ;;  %2176 = vmatmul.mubr.bf16.vlgmr.msra.gmra.mrb[0].mxu1 %v2967_v25 }
  0xc9   : > { %2181 = vmatprep.mubr.msk.bf16.mxu1 %vm2583_vm0, %v2582_v4 }
 0x19a   : > { %v964_v35 = vpop.f32.mrb[0].mxu0 }
 0x19b   : > { %v966_v36 = vpop.f32.mrb[1].mxu0  ;;  %v965_v40 = vadd.f32 %v964_v35, %v790_v34  ;;  %v1005_v46 = vpop.f32.mrb[0].mxu1 }
 0x19c   : > { %v967_v37 = vadd.f32 %v966_v36, %v794_v33  ;;  %v968_v38 = vpop.f32.mrb[2].mxu0  ;;  %v1006_v47 = vadd.f32 %v1005_v46, %v798_v45  ;;  %v2177_v48 = vpop.f32.mrb[1].mxu1 }
 0x19d   : > { %v969_v39 = vpop.f32.mrb[3].mxu0  ;;  %v1011_v43 = vpack.c.bf16 %v965_v40, %v965_v40  ;;  %v1008_v49 = vpop.f32.mrb[2].mxu1  ;;  %v2348_v38 = vld [vmem:[%s3213_s17] sm:$0xff]   ;;  %v2350_v40 = vld [vmem:[%s3213_s17 + $0x10] sm:$0xff]  }
 0x19e   : > { %v1012_v41 = vpack.c.bf16 %v967_v37, %v967_v37  ;;  %v1013_v50 = vpack.c.bf16 %v1006_v47, %v1006_v47  ;;  %v2178_v51 = vpop.f32.mrb[3].mxu1  ;;  %2204 = vmatpush3.bf16.msra.mxu0 %v2348_v38  ;;  %v2349_v39 = vld [vmem:[%s3213_s17 + $0x8] sm:$0xff]  }
 0x19f   : > { %2205 = vmatprep.subr.bf16.mxu0 %v2582_v4  ;;  %v2388_v38 = vld [vmem:[%s2936_s4 + $0x60] sm:$0xff]  }
 0x1a0   : > { %v1019_v42 = vsel %vm1014_vm1, %v1012_v41, 0  ;;  %1136 = vrot.lane.b32.xlu1 %v1012_v41, %s2584_s3  ;;  %v1087_v52 = vsel %vm1085_vm2, %v1013_v50, 0  ;;  %v2351_v41 = vld [vmem:[%s3213_s17 + $0x18] sm:$0xff]  }
 0x1a1   : > { %2180 = vmatpush3.bf16.xpose.msra.mxu1 %v1019_v42  ;;  %v2352_v42 = vld [vmem:[%s3213_s17 + $0x20] sm:$0xff]  }
 0x1a2   : > { %2185 = vmatprep.subr.bf16.mxu1 %v2582_v4  ;;  %2206 = vmatpush3.bf16.msra.mxu0 %v2349_v39  ;;  %v2389_v39 = vld [vmem:[%s2936_s4 + $0x20] sm:$0xff]  }
 0x1a3   : > { %2207 = vmatprep.subr.bf16.mxu0 %v2582_v4 }
 0x1a4   : > { %1133 = vrot.lane.b32.xlu1 %v1011_v43, %s2584_s3 }
 0x1a6   : > { %2208 = vmatpush3.bf16.msra.mxu0 %v2350_v40  ;;  %v2390_v40 = vld [vmem:[%s2936_s4 + $0x68] sm:$0xff]  }
 0x1a7   : > { %2209 = vmatprep.subr.bf16.mxu0 %v2582_v4 }
 0x1a8   : > { %2182 = vmatmul.mubr.msk.bf16.vlgmr.msra.gmra.mrb[4].mxu1 %vm1014_vm1, %v1011_v43  ;;  %v2354_v43 = vld [vmem:[%s3213_s17 + $0x30] sm:$0xff]  }
 0x1a9   : > { %2187 = vmatprep.mubr.msk.bf16.mxu1 %vm2583_vm0, %v2582_v4  ;;  %2186 = vmatpush3.bf16.msra.mxu1 %v1087_v52  ;;  %v1368_v52 = vunpack.c.l.bf16 %v2967_v25  ;;  %v2364_v25 = vld [vmem:[%s2912_s12 + $0x24] ss:$8 sps:$4 sm:$0xff]  }
 0x1aa   : > { %2191 = vmatprep.subr.bf16.mxu1 %v2582_v4  ;;  %2210 = vmatpush3.bf16.msra.mxu0 %v2351_v41  ;;  %v2391_v41 = vld [vmem:[%s2936_s4 + $0x28] sm:$0xff]  }
 0x1ab   : > { %2211 = vmatprep.subr.bf16.mxu0 %v2582_v4 }
 0x1ae   : > { %2212 = vmatpush3.bf16.msra.mxu0 %v2352_v42  ;;  %v2392_v42 = vld [vmem:[%s2936_s4 + $0x70] sm:$0xff]  }
 0x1af   : > { %2213 = vmatprep.subr.bf16.mxu0 %v2582_v4 }
 0x212   : > { %v1137_v7 = vpop.permute.xlu1 %1136 }
 0x213   : > { %v1142_v9 = vsel %vm1014_vm1, %v1137_v7, 0  ;;  %v2365_v7 = vld [vmem:[%s2912_s12 + $0x30] ss:$8 sps:$4 sm:$0xff]  }
 0x216   : > { %v1134_v10 = vpop.permute.xlu1 %1133 }
 0x27b   : > { %v1055_v53 = vpop.f32.mrb[4].mxu1 }
 0x27c   : > { %v1061_v55 = vmul.f32 0.125, %v1055_v53  ;;  %v2183_v56 = vpop.f32.mrb[5].mxu1 }
 0x27d   : > { %v1058_v57 = vpop.f32.mrb[6].mxu1 }
 0x27e   : > { %v2184_v58 = vpop.f32.mrb[7].mxu1  ;;  %v1068_v59 = vadd.f32 %v2053_v54, %v1061_v55 }
 0x280   : > { %v1070_v60 = vsel %vm1069_vm3, %v1068_v59, -inf }
 0x281   : > { %1071 = vmax.xlane.f32.xlu0 %v1070_v60  ;;  %v2358_v60 = vld [vmem:[%s2912_s12 + $0x4] ss:$8 sps:$4 sm:$0xff]  }
 0x30e   : > { %v1072_v61 = vpop.xlane.xlu0 %1071 }
 0x30f   : > { %v1073_v62 = vsub.f32 %v1068_v59, %v1072_v61  ;;  %v2356_v59 = vld [vmem:[%s2912_s12] ss:$8 sps:$4 sm:$0xff]   ;;  %v2361_v61 = vld [vmem:[%s2912_s12 + $0x14] ss:$8 sps:$4 sm:$0xff]  }
 0x311   : > { %v1074_v63 = vmul.f32 1.442695, %v1073_v62  ;;  %v2359_v62 = vld [vmem:[%s2912_s12 + $0x10] ss:$8 sps:$4 sm:$0xff]  }
 0x313   : > { %2396 = vpow2.f32 %v1074_v63  ;;  %v2362_v63 = vld [vmem:[%s2912_s12 + $0x20] ss:$8 sps:$4 sm:$0xff]  }
 0x31d   : > { %v2397_v0 = vpop.eup %2396 }
 0x31e   : > { %v1076_v1 = vsel %vm1069_vm3, %v2397_v0, 0.0 }
 0x31f   : > { %1077 = vadd.xlane.f32.xlu0 %v1076_v1 }
 0x3ac   : > { %v1078_v2 = vpop.xlane.xlu0 %1077 }
 0x3ad   : > { %2398 = vrcp.f32 %v1078_v2 }
 0x3b7   : > { %v2399_v5 = vpop.eup %2398 }
 0x3b8   : > { %v1080_v6 = vmul.f32 %v2399_v5, %v2397_v0 }
 0x3ba   : > { %v1081_v8 = vpack.c.bf16 %v1080_v6, %v1080_v6  ;;  %v2367_v6 = vld [vmem:[%s2912_s12 + $0x34] ss:$8 sps:$4 sm:$0xff]  }
 0x3bc   : > { %2188 = vmatmul.mubr.msk.bf16.vlgmr.msra.gmra.mrb[8].mxu1 %vm1069_vm3, %v1081_v8  ;;  %v2370_v8 = vld [vmem:[%s2912_s12 + $0x44] ss:$8 sps:$4 sm:$0xff]  }
 0x3bd   : > { %2192 = vmatpush3.bf16.xpose.msra.mxu1 %v1142_v9  ;;  %2193 = vmatprep.mubr.msk.bf16.mxu1 %vm2583_vm0, %v2582_v4  ;;  %v2368_v9 = vld [vmem:[%s2912_s12 + $0x40] ss:$8 sps:$4 sm:$0xff]  }
 0x3be   : > { %2197 = vmatprep.subr.bf16.mxu1 %v2582_v4 }
 0x3c4   : > { %2194 = vmatmul.mubr.msk.bf16.vlgmr.msra.gmra.mrb[12].mxu1 %vm1014_vm1, %v1134_v10  ;;  %v2373_v10 = vld [vmem:[%s2912_s12 + $0x54] ss:$8 sps:$4 sm:$0xff]  }
 0x3c5   : > { %2199 = vmatprep.mubr.msk.bf16.mxu1 %vm2583_vm0, %v2582_v4 }
 0x48f   : > { %v1123_v11 = vpop.f32.mrb[8].mxu1 }
 0x490   : > { %v1129_v12 = vpack.c.bf16 %v1123_v11, %v1123_v11  ;;  %v2189_v13 = vpop.f32.mrb[9].mxu1  ;;  %v2371_v11 = vld [vmem:[%s2912_s12 + $0x50] ss:$8 sps:$4 sm:$0xff]  }
 0x491   : > { %v1126_v14 = vpop.f32.mrb[10].mxu1  ;;  %v2374_v13 = vld [vmem:[%s2912_s12 + $0x60] ss:$8 sps:$4 sm:$0xff]  }
 0x492   : > { %1131 = vst.msk [vmem:[#allocation3] sm:$0xf] %vm1130_vm4, %v1129_v12  ;;  %v2190_v15 = vpop.f32.mrb[11].mxu1  ;;  %v2376_v12 = vld [vmem:[%s2912_s12 + $0x64] ss:$8 sps:$4 sm:$0xff]  }
 0x493   : > { %v2379_v14 = vld [vmem:[%s2912_s12 + $0x74] ss:$8 sps:$4 sm:$0xff]   ;;  %v2377_v15 = vld [vmem:[%s2912_s12 + $0x70] ss:$8 sps:$4 sm:$0xff]  }
 0x497   : > { %v1178_v16 = vpop.f32.mrb[12].mxu1 }
 0x498   : > { %v1184_v17 = vmul.f32 0.125, %v1178_v16  ;;  %v2195_v18 = vpop.f32.mrb[13].mxu1 }
 0x499   : > { %v1181_v19 = vpop.f32.mrb[14].mxu1 }
 0x49a   : > { %v2196_v20 = vpop.f32.mrb[15].mxu1  ;;  %v1185_v21 = vadd.f32 %v2053_v54, %v1184_v17 }
 0x49b   : > { %v2067_v20 = vld [vmem:[%s3217_s29] ss:$0 sm:$0xff] }
 0x49c   : > { %v1186_v22 = vsel %vm1069_vm3, %v1185_v21, -inf }
 0x49d   : > { %1187 = vmax.xlane.f32.xlu0 %v1186_v22  ;;  %v2068_v22 = vld [vmem:[%s3219_s11] ss:$0 sm:$0xff] }
 0x4b3   : > { %1199 = vrot.lane.b32.xlu0 %v1013_v50, %s2584_s3 }
 0x52a   : > { %v1188_v23 = vpop.xlane.xlu0 %1187 }
 0x52b   : > { %v1189_v24 = vsub.f32 %v1185_v21, %v1188_v23 }
 0x52d   : > { %v1190_v26 = vmul.f32 1.442695, %v1189_v24 }
 0x52e   : > { %v1200_v27 = vpop.permute.xlu0 %1199 }
 0x52f   : > { %2400 = vpow2.f32 %v1190_v26  ;;  %v1205_v28 = vsel %vm1085_vm2, %v1200_v27, 0  ;;  %v2380_v27 = vld [vmem:[%s2936_s4 + $0x40] sm:$0xff]  }
 0x530   : > { %2198 = vmatpush3.bf16.msra.mxu1 %v1205_v28  ;;  %v2381_v28 = vld [vmem:[%s2936_s4] sm:$0xff]  }
 0x531   : > { %1507 = vmatprep.subr.bf16.mxu1 %v2358_v60 }
 0x539   : > { %v2401_v31 = vpop.eup %2400 }
 0x53a   : > { %v1192_v33 = vsel %vm1069_vm3, %v2401_v31, 0.0 }
 0x53b   : > { %1193 = vadd.xlane.f32.xlu1 %v1192_v33  ;;  %v2383_v33 = vld [vmem:[%s2936_s4 + $0x8] sm:$0xff]  }
 0x5c8   : > { %v1194_v34 = vpop.xlane.xlu1 %1193 }
 0x5c9   : > { %2402 = vrcp.f32 %v1194_v34  ;;  %v2384_v34 = vld [vmem:[%s2936_s4 + $0x50] sm:$0xff]  }
 0x5d3   : > { %v2403_v35 = vpop.eup %2402 }
 0x5d4   : > { %v1196_v36 = vmul.f32 %v2403_v35, %v2401_v31  ;;  %v2382_v31 = vld [vmem:[%s2936_s4 + $0x48] sm:$0xff]   ;;  %v2385_v35 = vld [vmem:[%s2936_s4 + $0x10] sm:$0xff]  }
 0x5d6   : > { %v1197_v37 = vpack.c.bf16 %v1196_v36, %v1196_v36  ;;  %v2386_v36 = vld [vmem:[%s2936_s4 + $0x58] sm:$0xff]  }
 0x5d8   : > { %2200 = vmatmul.mubr.msk.bf16.vlgmr.msra.gmra.mrb[16].mxu1 %vm1069_vm3, %v1197_v37  ;;  %v2387_v37 = vld [vmem:[%s2936_s4 + $0x18] sm:$0xff]  }
 0x5d9   : > { %1539 = vmatprep.mubr.bf16.mxu1 %v2581_v3  ;;  %v2353_v3 = vld [vmem:[%s3213_s17 + $0x28] sm:$0xff]   ;;  %1508 = vmatpush1.bf16.msra.mxu1 %v2356_v59 }
 0x5da   : > { %2214 = vmatpush3.bf16.msra.mxu0 %v2353_v3  ;;  %1509 = vmatprep.subr.bf16.mxu1 %v2361_v61  ;;  %v2393_v3 = vld [vmem:[%s2936_s4 + $0x30] sm:$0xff]  }
 0x5db   : > { %2215 = vmatprep.subr.bf16.mxu0 %v2582_v4 }
 0x5dd   : > { %1510 = vmatpush1.bf16.msra.mxu1 %v2359_v62 }
 0x5de   : > { %2216 = vmatpush3.bf16.msra.mxu0 %v2354_v43  ;;  %1511 = vmatprep.subr.bf16.mxu1 %v2364_v25  ;;  %v2394_v43 = vld [vmem:[%s2936_s4 + $0x78] sm:$0xff]  }
 0x5df   : > { %2217 = vmatprep.subr.bf16.mxu0 %v2582_v4  ;;  %v2058_v4 = vld [vmem:[%s3215_s15] ss:$0 sm:$0xff] }
 0x5e1   : > { %1512 = vmatpush1.bf16.msra.mxu1 %v2362_v63 }
 0x5e2   : > { %2218 = vmatpush3.bf16.msra.mxu0 %v2355_v44  ;;  %1513 = vmatprep.subr.bf16.mxu1 %v2367_v6  ;;  %v2395_v44 = vld [vmem:[%s2936_s4 + $0x38] sm:$0xff]  }
 0x5e3   : > { %2137 = vmatprep.subr.bf16.mxu0 %v2380_v27 }
 0x5e5   : > { %1514 = vmatpush1.bf16.msra.mxu1 %v2365_v7 }
 0x5e6   : > { %1515 = vmatprep.subr.bf16.mxu1 %v2370_v8  ;;  %v2085_v8 = vld [vmem:[%s733_s19] ss:$0 sm:$0xff] }
 0x5e9   : > { %1516 = vmatpush1.bf16.msra.mxu1 %v2368_v9 }
 0x5ea   : > { %1517 = vmatprep.subr.bf16.mxu1 %v2373_v10 }
 0x5ed   : > { %1518 = vmatpush1.bf16.msra.mxu1 %v2371_v11 }
 0x5ee   : > { %1519 = vmatprep.subr.bf16.mxu1 %v2376_v12 }
 0x5f1   : > { %1520 = vmatpush1.bf16.msra.mxu1 %v2374_v13 }
 0x5f2   : > { %1521 = vmatprep.subr.bf16.mxu1 %v2379_v14 }
 0x5f5   : > { %1522 = vmatpush1.bf16.msra.mxu1 %v2377_v15 }
 0x6ab   : > { %v1241_v45 = vpop.f32.mrb[16].mxu1 }
 0x6ac   : > { %v2110_v46 = vpack.c.bf16 %v1241_v45, %v1241_v45  ;;  %v2201_v47 = vpop.f32.mrb[17].mxu1  ;;  %v1415_v45 = vld [vmem:[%s2917_s25] sm:$0x3] }
 0x6ad   : > { %v1244_v48 = vpop.f32.mrb[18].mxu1  ;;  %v1424_v47 = vrot.slane %v1415_v45, %v793_v30 }
 0x6ae   : > { %1251 = vrot.lane.b32.xlu0 %v2110_v46, %s2584_s3  ;;  %v2202_v49 = vpop.f32.mrb[19].mxu1  ;;  %v1420_v46 = vrot.slane %v1415_v45, %v789_v32 }
 0x720   : > { %v1252_v50 = vpop.permute.xlu0 %1251 }
 0x721   : > { %1255 = vst.msk [vmem:[#allocation3] sm:$0xf] %vm1254_vm5, %v1252_v50 }
 0x728   : > { %v1256_v51 = vld [vmem:[#allocation3] sm:$0xf] }
 0x729   : > { %2220 = vmatmul.mubr.bf16.vlgmr.msra.gmra.mrb[4].mxu0 %v1256_v51 }
 0x72a   : > { %2138 = vmatpush3.bf16.msra.mxu0 %v2381_v28 }
 0x72b   : > { %2139 = vmatprep.subr.bf16.mxu0 %v2382_v31 }
 0x72e   : > { %2140 = vmatpush3.bf16.msra.mxu0 %v2383_v33 }
 0x72f   : > { %2141 = vmatprep.subr.bf16.mxu0 %v2384_v34 }
 0x732   : > { %2142 = vmatpush3.bf16.msra.mxu0 %v2385_v35 }
 0x733   : > { %2143 = vmatprep.subr.bf16.mxu0 %v2386_v36 }
 0x736   : > { %2144 = vmatpush3.bf16.msra.mxu0 %v2387_v37 }
 0x737   : > { %2145 = vmatprep.subr.bf16.mxu0 %v2388_v38 }
 0x73a   : > { %2146 = vmatpush3.bf16.msra.mxu0 %v2389_v39 }
 0x73b   : > { %2147 = vmatprep.subr.bf16.mxu0 %v2390_v40 }
 0x73e   : > { %2148 = vmatpush3.bf16.msra.mxu0 %v2391_v41 }
 0x73f   : > { %2149 = vmatprep.subr.bf16.mxu0 %v2392_v42 }
 0x742   : > { %2150 = vmatpush3.bf16.msra.mxu0 %v2393_v3 }
 0x743   : > { %2151 = vmatprep.subr.bf16.mxu0 %v2394_v43 }
 0x746   : > { %2152 = vmatpush3.bf16.msra.mxu0 %v2395_v44 }
 0x7fc   : > { %v1362_v53 = vpop.f32.mrb[4].mxu0 }
 0x7fd   : > { %v1363_v54 = vadd.f32 %v2058_v4, %v1362_v53  ;;  %v2221_v55 = vpop.f32.mrb[5].mxu0 }
 0x7fe   : > { %v1365_v56 = vpop.f32.mrb[6].mxu0 }
 0x7ff   : > { %v2222_v57 = vpop.f32.mrb[7].mxu0  ;;  %v1369_v58 = vadd.f32 %v1368_v52, %v1363_v54 }
 0x801   : > { %1372 = vadd.xlane.f32.xlu0 %v1369_v58 }
 0x88e   : > { %v1373_v0 = vpop.xlane.xlu0 %1372 }
 0x88f   : > { %v1375_v1 = vmul.f32 0.0078125, %v1373_v0 }
 0x891   : > { %v1376_v2 = vsub.f32 %v1369_v58, %v1375_v1 }
 0x893   : > { %v1377_v5 = vmul.f32 %v1376_v2, %v1376_v2 }
 0x895   : > { %1378 = vadd.xlane.f32.xlu1 %v1377_v5 }
 0x922   : > { %v1379_v16 = vpop.xlane.xlu1 %1378 }
 0x923   : > { %v1380_v17 = vmul.f32 0.0078125, %v1379_v16 }
 0x925   : > { %v1381_v18 = vadd.f32 1e-12, %v1380_v17 }
 0x927   : > { %2404 = vrsqrt.f32 %v1381_v18 }
 0x931   : > { %v2405_v19 = vpop.eup %2404 }
 0x932   : > { %v1383_v21 = vmul.f32 %v2405_v19, %v1376_v2 }
 0x934   : > { %v1390_v23 = vmul.f32 %v2067_v20, %v1383_v21 }
 0x936   : > { %v3072_v24 = vadd.f32 %v2068_v22, %v1390_v23  ;;  %v2102_v23 = vld [vmem:[%s736_s28] ss:$0 sm:$0xff] }
 0x938   : > { %v1398_v26 = vpack.c.bf16 %v3072_v24, %v3072_v24 }
 0x93a   : > { %1540 = vmatmul.mubr.bf16.vlgmr.msra.gmra.mrb[20].mxu1 %v1398_v26 }
 0xa0d   : > { %v1541_v48 = vpop.f32.mrb[20].mxu1 }
 0xa0e   : > { %v1542_v49 = vadd.f32 %v1541_v48, %v1420_v46  ;;  %v1543_v50 = vpop.f32.mrb[21].mxu1 }
 0xa0f   : > { %v1544_v51 = vadd.f32 %v1543_v50, %v1424_v47  ;;  %v1545_v4 = vpop.f32.mrb[22].mxu1 }
 0xa10   : > { %v1548_v52 = vmul.f32 %v1542_v49, %v1542_v49  ;;  %v1546_v53 = vpop.f32.mrb[23].mxu1 }
 0xa11   : > { %v1549_v54 = vmul.f32 %v1544_v51, %v1544_v51 }
 0xa12   : > { %v1550_v55 = vmul.f32 %v1548_v52, %v1542_v49 }
 0xa13   : > { %v1551_v56 = vmul.f32 %v1549_v54, %v1544_v51 }
 0xa14   : > { %v1552_v57 = vmul.f32 0.044715, %v1550_v55 }
 0xa15   : > { %v1553_v58 = vmul.f32 0.044715, %v1551_v56 }
 0xa16   : > { %v1554_v59 = vadd.f32 %v1552_v57, %v1542_v49 }
 0xa17   : > { %v1555_v60 = vadd.f32 %v1553_v58, %v1544_v51 }
 0xa18   : > { %v1556_v61 = vmul.f32 0.7978846, %v1554_v59 }
 0xa19   : > { %v1557_v62 = vmul.f32 0.7978846, %v1555_v60 }
 0xa1a   : > { %2406 = vtanh.f32 %v1556_v61 }
 0xa1b   : > { %2408 = vtanh.f32 %v1557_v62 }
 0xa24   : > { %v2407_v29 = vpop.eup %2406 }
 0xa25   : > { %v2409_v30 = vpop.eup %2408  ;;  %v1560_v32 = vadd.f32 1.0, %v2407_v29 }
 0xa26   : > { %v1561_v25 = vadd.f32 1.0, %v2409_v30 }
 0xa27   : > { %v1562_v63 = vmul.f32 0.5, %v1560_v32 }
 0xa28   : > { %v1563_v0 = vmul.f32 0.5, %v1561_v25 }
 0xa29   : > { %v1564_v1 = vmul.f32 %v1562_v63, %v1542_v49 }
 0xa2a   : > { %v1565_v2 = vmul.f32 %v1563_v0, %v1544_v51 }
 0xa2b   : > { %v1566_v6 = vpack.c.bf16 %v1564_v1, %v1564_v1 }
 0xa2c   : > { %v1567_v5 = vpack.c.bf16 %v1565_v2, %v1565_v2 }
 0xa2e   : > { %1735 = vmatprep.mubr.bf16.mxu0 %v1567_v5 }
 0xa2f   : > { %1736 = vmatmul.mubr.bf16.vlgmr.msra.gmra.mrb[8].mxu0 %v1566_v6 }
 0xb02   : > { %v2153_v7 = vpop.f32.mrb[8].mxu0 }
 0xb03   : > { %v2154_v9 = vpop.f32.mrb[9].mxu0 }
 0xb04   : > { %v2155_v10 = vadd.f32 %v2154_v9, %v2153_v7  ;;  %v2156_v11 = vpop.f32.mrb[10].mxu0 }
 0xb05   : > { %v2157_v12 = vpop.f32.mrb[11].mxu0 }
 0xb06   : > { %v1738_v13 = vadd.f32 %v2155_v10, %v2085_v8 }
 0xb08   : > { %v1743_v14 = vadd.f32 %v1738_v13, %v3072_v24  ;;  %v2103_v24 = vld [vmem:[%s739_s22] ss:$0 sm:$0xff] }
 0xb0a   : > { %1746 = vadd.xlane.f32.xlu1 %v1743_v14 }
 0xb97   : > { %v1747_v15 = vpop.xlane.xlu1 %1746 }
 0xb98   : > { %v1748_v16 = vmul.f32 0.0078125, %v1747_v15 }
 0xb9a   : > { %v1749_v17 = vsub.f32 %v1743_v14, %v1748_v16 }
 0xb9c   : > { %v1750_v18 = vmul.f32 %v1749_v17, %v1749_v17 }
 0xb9e   : > { %1751 = vadd.xlane.f32.xlu1 %v1750_v18 }
 0xc2b   : > { %v1752_v19 = vpop.xlane.xlu1 %1751 }
 0xc2c   : > { %v1753_v20 = vmul.f32 0.0078125, %v1752_v19 }
 0xc2e   : > { %v1754_v21 = vadd.f32 1e-12, %v1753_v20 }
 0xc30   : > { %2410 = vrsqrt.f32 %v1754_v21 }
 0xc3a   : > { %v2411_v22 = vpop.eup %2410 }
 0xc3b   : > { %v1756_v26 = vmul.f32 %v2411_v22, %v1749_v17 }
 0xc3d   : > { %v1763_v27 = vmul.f32 %v2102_v23, %v1756_v26  ;;  %1776 = sbr.rel (%p2104_p11) target bundleno = 3140 (0xc44), region = 96 }
 0xc3f   : > { %v1770_v28 = vadd.f32 %v2103_v24, %v1763_v27 }
 0xc41   : > { %v1771_v31 = vpack.c.bf16 %v1770_v28, %v1770_v28 }
 0xc43   : > { %1772 = vst [vmem:[#allocation2] sm:$0xf] %v1771_v31  ;;  %1777 = vst [vmem:[%s2934_s23] sm:$0xf] (!%p2104_p11), %v1771_v31 }
 0xc44 PF: > { %s3223_s5 = sld [smem:[#allocation15_spill]]  ;;  %s3224_s29 = sld [smem:[#allocation11_spill]] }
 0xc45   : > { %s3225_s30 = sld [smem:[#allocation12_spill]]  ;;  %s3226_s15 = sld [smem:[#allocation18_spill]] }
 0xc46   : > { %s3227_s16 = sld [smem:[#allocation13_spill]]  ;;  %s3228_s17 = sld [smem:[#allocation14_spill]] }
 0xc47   : > { %s3229_s18 = sld [smem:[#allocation16_spill]]  ;;  %s3230_s19 = sld [smem:[#allocation17_spill]] }
 0xc4a   : > { %s30_s20 = sadd.s32 1, %s3223_s5  }
 0xc4b   : > { %p27_p4 = scmp.ge.s32.totalorder %s30_s20, 6  }
 0xc4d   :  { %29 = sbr.rel (!%p27_p4) target bundleno = 22 (0x16), region = 181 }
 0xc54   :  { %1797 = vsyncpa [#allocation5], 1 }
 0xc55   :  { %1799 = vsyncpa [#allocation5 + $0x1], 1 }
 0xc56   :  { %1800 = vsyncpa [#allocation7], 1 }
 0xc57   :  { %1802 = vsyncpa [#allocation7 + $0x1], 1 }

</bundles_post_ra>
